<compile_context>
chip_gen: v7x
topology: tpu7x:2x2x1
jax: 0.10.0
libtpu: 0.0.40
codegen_flags: <defaults>
</compile_context>

<pallas_src>
import jax
import jax.numpy as jnp
from jax.experimental import pallas as pl
from jax.experimental.pallas import tpu as pltpu


PARAM_SHAPES = {
    # STN3d: conv1 3->128, conv2 128->256, conv3 256->512
    "sw1": (3, 128),   "sb1": (1, 128),
    "sw2": (128, 256), "sb2": (1, 256),
    "sw3": (256, 512), "sb3": (1, 512),
    # STN3d: fc1 512->256, fc2 256->128, fc3 128->9
    "fw1": (512, 256), "fb1": (1, 256),
    "fw2": (256, 128), "fb2": (1, 128),
    "fw3": (128, 9),   "fb3": (1, 9),
    # PointNetfeat: conv1 3->512, conv2 512->256, conv3 256->128
    "cw1": (3, 512),   "cb1": (1, 512),
    "cw2": (512, 256), "cb2": (1, 256),
    "cw3": (256, 128), "cb3": (1, 128),
}


def make_params(key):
  """Deterministic synthetic f32 parameters (shapes from the module __init__)."""
  params = {}
  keys = jax.random.split(key, len(PARAM_SHAPES))
  for k, (name, shp) in zip(keys, sorted(PARAM_SHAPES.items())):
    params[name] = 0.1 * jax.random.normal(k, shp, dtype=jnp.float32)
  return params


def _prepare_weights(p):
  """Kernel-side weight prep: bf16 for the wide MXU layers, fc3 padded to 128
  output lanes (lane-dense trans store) with the STN identity folded in."""
  bf16 = jnp.bfloat16
  iden = jnp.array([[1, 0, 0, 0, 1, 0, 0, 0, 1]], dtype=jnp.float32)
  fw3p = jnp.zeros((128, 128), jnp.float32).at[:, :9].set(p["fw3"])
  fb3p = jnp.zeros((1, 128), jnp.float32).at[:, :9].set(p["fb3"] + iden)
  return [
      p["sw1"], p["sb1"],                       # K=3 layer stays f32 (VPU path)
      p["sw2"].astype(bf16), p["sb2"],
      p["sw3"].astype(bf16), p["sb3"],
      p["fw1"].astype(bf16), p["fb1"],
      p["fw2"].astype(bf16), p["fb2"],
      fw3p, fb3p,                               # tiny final FC kept f32
      p["cw1"], p["cb1"],                       # K=3 layer stays f32 (VPU path)
      p["cw2"].astype(bf16), p["cb2"],
      p["cw3"].astype(bf16), p["cb3"],
  ]


def _make_kernel(bt, n):
  m = bt * n
  f32, bf16 = jnp.float32, jnp.bfloat16

  def kernel(x_ref,
             sw1, sb1, sw2, sb2, sw3, sb3,
             fw1, fb1, fw2, fb2, fw3, fb3,
             cw1, cb1, cw2, cb2, cw3, cb3,
             feat_ref, trans_ref):
    x = x_ref[...]                                                     # (M, 3) f32
    x0, x1, x2 = x[:, 0:1], x[:, 1:2], x[:, 2:3]

    # ---------------- STN3d point MLP ----------------
    # conv1 (K=3) as VPU broadcast FMAs instead of a zero-padded MXU matmul.
    h = jnp.maximum(x0 * sw1[0:1, :] + x1 * sw1[1:2, :] + x2 * sw1[2:3, :]
                    + sb1[...], 0.0)                                   # (M, 128)
    h = jnp.maximum(jnp.dot(h.astype(bf16), sw2[...],
                            preferred_element_type=f32) + sb2[...], 0.0)   # (M, 256)
    h = jnp.maximum(jnp.dot(h.astype(bf16), sw3[...],
                            preferred_element_type=f32) + sb3[...], 0.0)   # (M, 512)
    g = jnp.max(h.reshape(bt, n, 512), axis=1)                         # (Bt, 512) per-batch max

    # ---------------- STN3d FC head (batched over the tile) ----------------
    g = jnp.maximum(jnp.dot(g.astype(bf16), fw1[...],
                            preferred_element_type=f32) + fb1[...], 0.0)   # (Bt, 256)
    g = jnp.maximum(jnp.dot(g.astype(bf16), fw2[...],
                            preferred_element_type=f32) + fb2[...], 0.0)   # (Bt, 128)
    # lanes 0..8 = flattened 3x3 transform (identity folded), lanes 9..127 = 0
    t = jnp.dot(g, fw3[...], preferred_element_type=f32) + fb3[...]    # (Bt, 128)
    trans_ref[0] = t                                                   # lane-dense store

    # ---------------- feature MLP ----------------
    # Per-row transform coefficients (each row gets its batch's 9 values).
    trow = jnp.broadcast_to(t[:, None, :], (bt, n, 128)).reshape(m, 128)
    # Fold the 3x3 transform into conv1:  out = (x @ T) @ cw1, all on the VPU.
    acc = None
    for c in range(3):
      xt_c = (x0 * trow[:, c:c + 1]
              + x1 * trow[:, 3 + c:4 + c]
              + x2 * trow[:, 6 + c:7 + c])                             # (M, 1)
      term = xt_c * cw1[c:c + 1, :]                                    # (M, 512)
      acc = term if acc is None else acc + term
    h = jnp.maximum(acc + cb1[...], 0.0)                               # (M, 512)
    h = jnp.maximum(jnp.dot(h.astype(bf16), cw2[...],
                            preferred_element_type=f32) + cb2[...], 0.0)   # (M, 256)
    h = jnp.dot(h.astype(bf16), cw3[...],
                preferred_element_type=f32) + cb3[...]                 # (M, 128), no ReLU
    feat_ref[0] = jnp.max(h.reshape(bt, n, 128), axis=1)               # (Bt, 128)

  return kernel


def _choose_batch_tile(B, N):
  """Pick Bt so Bt*N >= ~256 rows (fills the MXU M dim / amortizes grid-step
  overhead) while whole-tile activations stay within a conservative VMEM
  budget (safe on v5e's scoped default; v6e/v7x have more headroom)."""
  bt = min(B, max(1, -(-256 // N)))            # ceil(256/N), capped at B
  max_rows = max(N, (16 * 2**20) // 8192)      # ~8 KiB live f32 activations/row
  while bt > 1 and bt * N > max_rows:
    bt -= 1
  return bt


def pointnetfeat(x_bn3, params):
  """x_bn3: (B, N, 3) float32 (transpose of PyTorch's (B, 3, N) Conv1d layout).
  Returns (feat (B, 128), trans (B, 3, 3))."""
  B, N, C = x_bn3.shape
  assert C == 3
  assert N % 8 == 0, "point count must be a multiple of 8 (sublane tiling)"
  # TODO(synk): for very large N, tile the point axis with running-max VMEM
  # accumulators (and -inf masking of padded rows on the non-ReLU final layer).

  bt = _choose_batch_tile(B, N)
  g_steps = -(-B // bt)
  bpad = g_steps * bt
  if bpad != B:
    x_bn3 = jnp.concatenate(
        [x_bn3, jnp.zeros((bpad - B, N, 3), x_bn3.dtype)], axis=0)
  x2 = x_bn3.reshape(bpad * N, 3)              # flatten (batch, point) rows
  weights = _prepare_weights(params)

  def wspec(shape):
    nd = len(shape)
    return pl.BlockSpec(shape, lambda i, _nd=nd: (0,) * _nd)

  in_specs = ([pl.BlockSpec((bt * N, 3), lambda i: (i, 0))]
              + [wspec(w.shape) for w in weights])
  # Outputs shaped (G, Bt, 128) with (1, Bt, 128) blocks: trailing block dims
  # equal the full array dims -> unmasked, lane-dense stores for any Bt.
  out_specs = [pl.BlockSpec((1, bt, 128), lambda i: (i, 0, 0)),
               pl.BlockSpec((1, bt, 128), lambda i: (i, 0, 0))]

  flops = int(2 * bpad * N * (3 * 128 + 128 * 256 + 256 * 512
                              + 3 * 512 + 512 * 256 + 256 * 128)
              + 2 * bpad * (512 * 256 + 256 * 128 + 128 * 128))
  bytes_accessed = int(x2.size * 4
                       + sum(w.size * w.dtype.itemsize for w in weights)
                       + bpad * 256 * 4)

  feat3, trans3 = pl.pallas_call(
      _make_kernel(bt, N),
      out_shape=(jax.ShapeDtypeStruct((g_steps, bt, 128), jnp.float32),
                 jax.ShapeDtypeStruct((g_steps, bt, 128), jnp.float32)),
      grid_spec=pltpu.PrefetchScalarGridSpec(
          num_scalar_prefetch=0,
          grid=(g_steps,),
          in_specs=in_specs,
          out_specs=out_specs),
      compiler_params=pltpu.CompilerParams(
          dimension_semantics=("parallel",),
          vmem_limit_bytes=32 * 1024 * 1024),
      cost_estimate=pl.CostEstimate(flops=flops, transcendentals=0,
                                    bytes_accessed=bytes_accessed),
  )(x2, *weights)

  feat = feat3.reshape(bpad, 128)[:B]
  trans = trans3.reshape(bpad, 128)[:B, :9].reshape(B, 3, 3)
  return feat, trans


def pointnetfeat_reference(x_bn3, p):
  """Pure-JAX reference matching the PyTorch forward (x given as (B, N, 3)),
  with the same bf16-matmul / f32-accumulate precision as the kernel."""
  relu = jax.nn.relu
  bf16 = jnp.bfloat16

  def mm(a, w):   # mirror the kernel's bf16 MXU dots
    return jnp.dot(a.astype(bf16), w.astype(bf16),
                   preferred_element_type=jnp.float32)

  iden = jnp.array([[1, 0, 0, 0, 1, 0, 0, 0, 1]], dtype=jnp.float32)
  x = x_bn3
  h = relu(x @ p["sw1"] + p["sb1"])
  h = relu(mm(h, p["sw2"]) + p["sb2"])
  h = relu(mm(h, p["sw3"]) + p["sb3"])
  g = jnp.max(h, axis=1)                               # (B, 512)
  g = relu(mm(g, p["fw1"]) + p["fb1"])
  g = relu(mm(g, p["fw2"]) + p["fb2"])
  t9 = g @ p["fw3"] + p["fb3"] + iden                  # (B, 9)
  trans = t9.reshape(-1, 3, 3)
  xt = jnp.einsum("bnc,bcd->bnd", x, trans)            # bmm(x^T, trans)
  h = relu(xt @ p["cw1"] + p["cb1"])
  h = relu(mm(h, p["cw2"]) + p["cb2"])
  h = mm(h, p["cw3"]) + p["cb3"]
  feat = jnp.max(h, axis=1)                            # (B, 128)
  return feat, trans


if __name__ == "__main__":
  key = jax.random.PRNGKey(0)
  pkey, xkey = jax.random.split(key)
  params = make_params(pkey)

  B, N = 2, 16
  # PyTorch input would be (B, 3, N); kernel layout is the transpose (B, N, 3).
  x_bn3 = jax.random.normal(xkey, (B, N, 3), dtype=jnp.float32)

  feat, trans = pointnetfeat(x_bn3, params)
  jax.block_until_ready((feat, trans))

  feat_ref, trans_ref = pointnetfeat_reference(x_bn3, params)
  assert feat.shape == (B, 128) and trans.shape == (B, 3, 3)
  if not (jnp.allclose(feat, feat_ref, atol=2e-3, rtol=2e-3)
          and jnp.allclose(trans, trans_ref, atol=2e-3, rtol=2e-3)):
    raise AssertionError("Pallas kernel output mismatch vs. reference")

  print("KERNEL_OK")
</pallas_src>

<mosaic_0001>
module attributes {stable_mosaic.version = 11 : i64} {
  func.func @kernel(%arg0: i32, %arg1: memref<32x3xf32, #tpu.memory_space<vmem>>, %arg2: memref<3x128xf32, #tpu.memory_space<vmem>>, %arg3: memref<1x128xf32, #tpu.memory_space<vmem>>, %arg4: memref<128x256xbf16, #tpu.memory_space<vmem>>, %arg5: memref<1x256xf32, #tpu.memory_space<vmem>>, %arg6: memref<256x512xbf16, #tpu.memory_space<vmem>>, %arg7: memref<1x512xf32, #tpu.memory_space<vmem>>, %arg8: memref<512x256xbf16, #tpu.memory_space<vmem>>, %arg9: memref<1x256xf32, #tpu.memory_space<vmem>>, %arg10: memref<256x128xbf16, #tpu.memory_space<vmem>>, %arg11: memref<1x128xf32, #tpu.memory_space<vmem>>, %arg12: memref<128x128xf32, #tpu.memory_space<vmem>>, %arg13: memref<1x128xf32, #tpu.memory_space<vmem>>, %arg14: memref<3x512xf32, #tpu.memory_space<vmem>>, %arg15: memref<1x512xf32, #tpu.memory_space<vmem>>, %arg16: memref<512x256xbf16, #tpu.memory_space<vmem>>, %arg17: memref<1x256xf32, #tpu.memory_space<vmem>>, %arg18: memref<256x128xbf16, #tpu.memory_space<vmem>>, %arg19: memref<1x128xf32, #tpu.memory_space<vmem>>, %arg20: memref<1x2x128xf32, #tpu.memory_space<vmem>>, %arg21: memref<1x2x128xf32, #tpu.memory_space<vmem>>) attributes {dimension_semantics = [#tpu.dimension_semantics<parallel>], iteration_bounds = array<i64: 1>, scalar_prefetch = 0 : i64, scratch_operands = 0 : i64, tpu.core_type = #tpu.core_type<tc>, window_params = [{transform_indices = @transform_0, window_bounds = array<i64: 32, 3>}, {pipeline_mode = #tpu.pipeline_mode<synchronous>, transform_indices = @transform_1, window_bounds = array<i64: 3, 128>}, {pipeline_mode = #tpu.pipeline_mode<synchronous>, transform_indices = @transform_2, window_bounds = array<i64: 1, 128>}, {pipeline_mode = #tpu.pipeline_mode<synchronous>, transform_indices = @transform_3, window_bounds = array<i64: 128, 256>}, {pipeline_mode = #tpu.pipeline_mode<synchronous>, transform_indices = @transform_4, window_bounds = array<i64: 1, 256>}, {pipeline_mode = #tpu.pipeline_mode<synchronous>, transform_indices = @transform_5, window_bounds = array<i64: 256, 512>}, {pipeline_mode = #tpu.pipeline_mode<synchronous>, transform_indices = @transform_6, window_bounds = array<i64: 1, 512>}, {pipeline_mode = #tpu.pipeline_mode<synchronous>, transform_indices = @transform_7, window_bounds = array<i64: 512, 256>}, {pipeline_mode = #tpu.pipeline_mode<synchronous>, transform_indices = @transform_8, window_bounds = array<i64: 1, 256>}, {pipeline_mode = #tpu.pipeline_mode<synchronous>, transform_indices = @transform_9, window_bounds = array<i64: 256, 128>}, {pipeline_mode = #tpu.pipeline_mode<synchronous>, transform_indices = @transform_10, window_bounds = array<i64: 1, 128>}, {pipeline_mode = #tpu.pipeline_mode<synchronous>, transform_indices = @transform_11, window_bounds = array<i64: 128, 128>}, {pipeline_mode = #tpu.pipeline_mode<synchronous>, transform_indices = @transform_12, window_bounds = array<i64: 1, 128>}, {pipeline_mode = #tpu.pipeline_mode<synchronous>, transform_indices = @transform_13, window_bounds = array<i64: 3, 512>}, {pipeline_mode = #tpu.pipeline_mode<synchronous>, transform_indices = @transform_14, window_bounds = array<i64: 1, 512>}, {pipeline_mode = #tpu.pipeline_mode<synchronous>, transform_indices = @transform_15, window_bounds = array<i64: 512, 256>}, {pipeline_mode = #tpu.pipeline_mode<synchronous>, transform_indices = @transform_16, window_bounds = array<i64: 1, 256>}, {pipeline_mode = #tpu.pipeline_mode<synchronous>, transform_indices = @transform_17, window_bounds = array<i64: 256, 128>}, {pipeline_mode = #tpu.pipeline_mode<synchronous>, transform_indices = @transform_18, window_bounds = array<i64: 1, 128>}, {transform_indices = @transform_19, window_bounds = array<i64: 1, 2, 128>}, {transform_indices = @transform_20, window_bounds = array<i64: 1, 2, 128>}]} {
    %c0 = arith.constant 0 : index
    %c0_0 = arith.constant 0 : index
    %0 = vector.load %arg1[%c0, %c0_0] : memref<32x3xf32, #tpu.memory_space<vmem>>, vector<32x3xf32>
    %1 = vector.extract_strided_slice %0 {offsets = [0, 0], sizes = [32, 1], strides = [1, 1]} : vector<32x3xf32> to vector<32x1xf32>
    %2 = vector.extract_strided_slice %0 {offsets = [0, 1], sizes = [32, 1], strides = [1, 1]} : vector<32x3xf32> to vector<32x1xf32>
    %3 = vector.extract_strided_slice %0 {offsets = [0, 2], sizes = [32, 1], strides = [1, 1]} : vector<32x3xf32> to vector<32x1xf32>
    %c0_1 = arith.constant 0 : index
    %c0_2 = arith.constant 0 : index
    %4 = vector.load %arg2[%c0_1, %c0_2] : memref<3x128xf32, #tpu.memory_space<vmem>>, vector<1x128xf32>
    %5 = vector.broadcast %1 : vector<32x1xf32> to vector<32x128xf32>
    %6 = vector.broadcast %4 : vector<1x128xf32> to vector<32x128xf32>
    %7 = arith.mulf %5, %6 : vector<32x128xf32>
    %c1 = arith.constant 1 : index
    %c0_3 = arith.constant 0 : index
    %8 = vector.load %arg2[%c1, %c0_3] : memref<3x128xf32, #tpu.memory_space<vmem>>, vector<1x128xf32>
    %9 = vector.broadcast %2 : vector<32x1xf32> to vector<32x128xf32>
    %10 = vector.broadcast %8 : vector<1x128xf32> to vector<32x128xf32>
    %11 = arith.mulf %9, %10 : vector<32x128xf32>
    %12 = arith.addf %7, %11 : vector<32x128xf32>
    %c2 = arith.constant 2 : index
    %c0_4 = arith.constant 0 : index
    %13 = vector.load %arg2[%c2, %c0_4] : memref<3x128xf32, #tpu.memory_space<vmem>>, vector<1x128xf32>
    %14 = vector.broadcast %3 : vector<32x1xf32> to vector<32x128xf32>
    %15 = vector.broadcast %13 : vector<1x128xf32> to vector<32x128xf32>
    %16 = arith.mulf %14, %15 : vector<32x128xf32>
    %17 = arith.addf %12, %16 : vector<32x128xf32>
    %c0_5 = arith.constant 0 : index
    %c0_6 = arith.constant 0 : index
    %18 = vector.load %arg3[%c0_5, %c0_6] : memref<1x128xf32, #tpu.memory_space<vmem>>, vector<1x128xf32>
    %19 = vector.broadcast %18 : vector<1x128xf32> to vector<32x128xf32>
    %20 = arith.addf %17, %19 : vector<32x128xf32>
    %cst = arith.constant 0.000000e+00 : f32
    %21 = vector.broadcast %cst : f32 to vector<32x128xf32>
    %22 = arith.maximumf %20, %21 : vector<32x128xf32>
    %23 = arith.truncf %22 : vector<32x128xf32> to vector<32x128xbf16>
    %c0_7 = arith.constant 0 : index
    %c0_8 = arith.constant 0 : index
    %24 = vector.load %arg4[%c0_7, %c0_8] : memref<128x256xbf16, #tpu.memory_space<vmem>>, vector<128x256xbf16>
    %cst_9 = arith.constant dense<0.000000e+00> : vector<32x256xf32>
    %25 = tpu.matmul %23, %24, %cst_9 {dimension_numbers = #tpu.dot_dimension_numbers<[1], [0], [0], [1], [0, 0, 1, 1], [], []>} : vector<32x128xbf16>, vector<128x256xbf16>, vector<32x256xf32> -> vector<32x256xf32>
    %c0_10 = arith.constant 0 : index
    %c0_11 = arith.constant 0 : index
    %26 = vector.load %arg5[%c0_10, %c0_11] : memref<1x256xf32, #tpu.memory_space<vmem>>, vector<1x256xf32>
    %27 = vector.broadcast %26 : vector<1x256xf32> to vector<32x256xf32>
    %28 = arith.addf %25, %27 : vector<32x256xf32>
    %cst_12 = arith.constant 0.000000e+00 : f32
    %29 = vector.broadcast %cst_12 : f32 to vector<32x256xf32>
    %30 = arith.maximumf %28, %29 : vector<32x256xf32>
    %31 = arith.truncf %30 : vector<32x256xf32> to vector<32x256xbf16>
    %c0_13 = arith.constant 0 : index
    %c0_14 = arith.constant 0 : index
    %32 = vector.load %arg6[%c0_13, %c0_14] : memref<256x512xbf16, #tpu.memory_space<vmem>>, vector<256x512xbf16>
    %cst_15 = arith.constant dense<0.000000e+00> : vector<32x512xf32>
    %33 = tpu.matmul %31, %32, %cst_15 {dimension_numbers = #tpu.dot_dimension_numbers<[1], [0], [0], [1], [0, 0, 1, 1], [], []>} : vector<32x256xbf16>, vector<256x512xbf16>, vector<32x512xf32> -> vector<32x512xf32>
    %c0_16 = arith.constant 0 : index
    %c0_17 = arith.constant 0 : index
    %34 = vector.load %arg7[%c0_16, %c0_17] : memref<1x512xf32, #tpu.memory_space<vmem>>, vector<1x512xf32>
    %35 = vector.broadcast %34 : vector<1x512xf32> to vector<32x512xf32>
    %36 = arith.addf %33, %35 : vector<32x512xf32>
    %cst_18 = arith.constant 0.000000e+00 : f32
    %37 = vector.broadcast %cst_18 : f32 to vector<32x512xf32>
    %38 = arith.maximumf %36, %37 : vector<32x512xf32>
    %39 = vector.shape_cast %38 : vector<32x512xf32> to vector<2x16x512xf32>
    %cst_19 = arith.constant dense<0xFF800000> : vector<2x512xf32>
    %40 = vector.multi_reduction <maximumf>, %39, %cst_19 [1] : vector<2x16x512xf32> to vector<2x512xf32>
    %41 = arith.truncf %40 : vector<2x512xf32> to vector<2x512xbf16>
    %c0_20 = arith.constant 0 : index
    %c0_21 = arith.constant 0 : index
    %42 = vector.load %arg8[%c0_20, %c0_21] : memref<512x256xbf16, #tpu.memory_space<vmem>>, vector<512x256xbf16>
    %cst_22 = arith.constant dense<0.000000e+00> : vector<2x256xf32>
    %43 = tpu.matmul %41, %42, %cst_22 {dimension_numbers = #tpu.dot_dimension_numbers<[1], [0], [0], [1], [0, 0, 1, 1], [], []>} : vector<2x512xbf16>, vector<512x256xbf16>, vector<2x256xf32> -> vector<2x256xf32>
    %c0_23 = arith.constant 0 : index
    %c0_24 = arith.constant 0 : index
    %44 = vector.load %arg9[%c0_23, %c0_24] : memref<1x256xf32, #tpu.memory_space<vmem>>, vector<1x256xf32>
    %45 = vector.broadcast %44 : vector<1x256xf32> to vector<2x256xf32>
    %46 = arith.addf %43, %45 : vector<2x256xf32>
    %cst_25 = arith.constant 0.000000e+00 : f32
    %47 = vector.broadcast %cst_25 : f32 to vector<2x256xf32>
    %48 = arith.maximumf %46, %47 : vector<2x256xf32>
    %49 = arith.truncf %48 : vector<2x256xf32> to vector<2x256xbf16>
    %c0_26 = arith.constant 0 : index
    %c0_27 = arith.constant 0 : index
    %50 = vector.load %arg10[%c0_26, %c0_27] : memref<256x128xbf16, #tpu.memory_space<vmem>>, vector<256x128xbf16>
    %cst_28 = arith.constant dense<0.000000e+00> : vector<2x128xf32>
    %51 = tpu.matmul %49, %50, %cst_28 {dimension_numbers = #tpu.dot_dimension_numbers<[1], [0], [0], [1], [0, 0, 1, 1], [], []>} : vector<2x256xbf16>, vector<256x128xbf16>, vector<2x128xf32> -> vector<2x128xf32>
    %c0_29 = arith.constant 0 : index
    %c0_30 = arith.constant 0 : index
    %52 = vector.load %arg11[%c0_29, %c0_30] : memref<1x128xf32, #tpu.memory_space<vmem>>, vector<1x128xf32>
    %53 = vector.broadcast %52 : vector<1x128xf32> to vector<2x128xf32>
    %54 = arith.addf %51, %53 : vector<2x128xf32>
    %cst_31 = arith.constant 0.000000e+00 : f32
    %55 = vector.broadcast %cst_31 : f32 to vector<2x128xf32>
    %56 = arith.maximumf %54, %55 : vector<2x128xf32>
    %c0_32 = arith.constant 0 : index
    %c0_33 = arith.constant 0 : index
    %57 = vector.load %arg12[%c0_32, %c0_33] : memref<128x128xf32, #tpu.memory_space<vmem>>, vector<128x128xf32>
    %cst_34 = arith.constant dense<0.000000e+00> : vector<2x128xf32>
    %58 = tpu.matmul %56, %57, %cst_34 {dimension_numbers = #tpu.dot_dimension_numbers<[1], [0], [0], [1], [0, 0, 1, 1], [], []>} : vector<2x128xf32>, vector<128x128xf32>, vector<2x128xf32> -> vector<2x128xf32>
    %c0_35 = arith.constant 0 : index
    %c0_36 = arith.constant 0 : index
    %59 = vector.load %arg13[%c0_35, %c0_36] : memref<1x128xf32, #tpu.memory_space<vmem>>, vector<1x128xf32>
    %60 = vector.broadcast %59 : vector<1x128xf32> to vector<2x128xf32>
    %61 = arith.addf %58, %60 : vector<2x128xf32>
    %c0_37 = arith.constant 0 : index
    %c0_38 = arith.constant 0 : index
    %c0_39 = arith.constant 0 : index
    %62 = vector.load %arg21[%c0_37, %c0_38, %c0_39] : memref<1x2x128xf32, #tpu.memory_space<vmem>>, vector<1x2x128xf32>
    %63 = vector.shape_cast %62 : vector<1x2x128xf32> to vector<2x128xf32>
    %64 = vector.shape_cast %61 : vector<2x128xf32> to vector<1x2x128xf32>
    tpu.vector_store %arg21[%c0_37, %c0_38, %c0_39], %64 {strides = array<i32>} : memref<1x2x128xf32, #tpu.memory_space<vmem>>, vector<1x2x128xf32>,
    %65 = vector.shape_cast %61 : vector<2x128xf32> to vector<2x1x128xf32>
    %66 = vector.shape_cast %65 : vector<2x1x128xf32> to vector<2x1x128xf32>
    %67 = vector.broadcast %66 : vector<2x1x128xf32> to vector<2x16x128xf32>
    %68 = vector.shape_cast %67 : vector<2x16x128xf32> to vector<32x128xf32>
    %69 = vector.extract_strided_slice %68 {offsets = [0, 0], sizes = [32, 1], strides = [1, 1]} : vector<32x128xf32> to vector<32x1xf32>
    %70 = arith.mulf %1, %69 : vector<32x1xf32>
    %71 = vector.extract_strided_slice %68 {offsets = [0, 3], sizes = [32, 1], strides = [1, 1]} : vector<32x128xf32> to vector<32x1xf32>
    %72 = arith.mulf %2, %71 : vector<32x1xf32>
    %73 = arith.addf %70, %72 : vector<32x1xf32>
    %74 = vector.extract_strided_slice %68 {offsets = [0, 6], sizes = [32, 1], strides = [1, 1]} : vector<32x128xf32> to vector<32x1xf32>
    %75 = arith.mulf %3, %74 : vector<32x1xf32>
    %76 = arith.addf %73, %75 : vector<32x1xf32>
    %c0_40 = arith.constant 0 : index
    %c0_41 = arith.constant 0 : index
    %77 = vector.load %arg14[%c0_40, %c0_41] : memref<3x512xf32, #tpu.memory_space<vmem>>, vector<1x512xf32>
    %78 = vector.broadcast %76 : vector<32x1xf32> to vector<32x512xf32>
    %79 = vector.broadcast %77 : vector<1x512xf32> to vector<32x512xf32>
    %80 = arith.mulf %78, %79 : vector<32x512xf32>
    %81 = vector.extract_strided_slice %68 {offsets = [0, 1], sizes = [32, 1], strides = [1, 1]} : vector<32x128xf32> to vector<32x1xf32>
    %82 = arith.mulf %1, %81 : vector<32x1xf32>
    %83 = vector.extract_strided_slice %68 {offsets = [0, 4], sizes = [32, 1], strides = [1, 1]} : vector<32x128xf32> to vector<32x1xf32>
    %84 = arith.mulf %2, %83 : vector<32x1xf32>
    %85 = arith.addf %82, %84 : vector<32x1xf32>
    %86 = vector.extract_strided_slice %68 {offsets = [0, 7], sizes = [32, 1], strides = [1, 1]} : vector<32x128xf32> to vector<32x1xf32>
    %87 = arith.mulf %3, %86 : vector<32x1xf32>
    %88 = arith.addf %85, %87 : vector<32x1xf32>
    %c1_42 = arith.constant 1 : index
    %c0_43 = arith.constant 0 : index
    %89 = vector.load %arg14[%c1_42, %c0_43] : memref<3x512xf32, #tpu.memory_space<vmem>>, vector<1x512xf32>
    %90 = vector.broadcast %88 : vector<32x1xf32> to vector<32x512xf32>
    %91 = vector.broadcast %89 : vector<1x512xf32> to vector<32x512xf32>
    %92 = arith.mulf %90, %91 : vector<32x512xf32>
    %93 = arith.addf %80, %92 : vector<32x512xf32>
    %94 = vector.extract_strided_slice %68 {offsets = [0, 2], sizes = [32, 1], strides = [1, 1]} : vector<32x128xf32> to vector<32x1xf32>
    %95 = arith.mulf %1, %94 : vector<32x1xf32>
    %96 = vector.extract_strided_slice %68 {offsets = [0, 5], sizes = [32, 1], strides = [1, 1]} : vector<32x128xf32> to vector<32x1xf32>
    %97 = arith.mulf %2, %96 : vector<32x1xf32>
    %98 = arith.addf %95, %97 : vector<32x1xf32>
    %99 = vector.extract_strided_slice %68 {offsets = [0, 8], sizes = [32, 1], strides = [1, 1]} : vector<32x128xf32> to vector<32x1xf32>
    %100 = arith.mulf %3, %99 : vector<32x1xf32>
    %101 = arith.addf %98, %100 : vector<32x1xf32>
    %c2_44 = arith.constant 2 : index
    %c0_45 = arith.constant 0 : index
    %102 = vector.load %arg14[%c2_44, %c0_45] : memref<3x512xf32, #tpu.memory_space<vmem>>, vector<1x512xf32>
    %103 = vector.broadcast %101 : vector<32x1xf32> to vector<32x512xf32>
    %104 = vector.broadcast %102 : vector<1x512xf32> to vector<32x512xf32>
    %105 = arith.mulf %103, %104 : vector<32x512xf32>
    %106 = arith.addf %93, %105 : vector<32x512xf32>
    %c0_46 = arith.constant 0 : index
    %c0_47 = arith.constant 0 : index
    %107 = vector.load %arg15[%c0_46, %c0_47] : memref<1x512xf32, #tpu.memory_space<vmem>>, vector<1x512xf32>
    %108 = vector.broadcast %107 : vector<1x512xf32> to vector<32x512xf32>
    %109 = arith.addf %106, %108 : vector<32x512xf32>
    %cst_48 = arith.constant 0.000000e+00 : f32
    %110 = vector.broadcast %cst_48 : f32 to vector<32x512xf32>
    %111 = arith.maximumf %109, %110 : vector<32x512xf32>
    %112 = arith.truncf %111 : vector<32x512xf32> to vector<32x512xbf16>
    %c0_49 = arith.constant 0 : index
    %c0_50 = arith.constant 0 : index
    %113 = vector.load %arg16[%c0_49, %c0_50] : memref<512x256xbf16, #tpu.memory_space<vmem>>, vector<512x256xbf16>
    %cst_51 = arith.constant dense<0.000000e+00> : vector<32x256xf32>
    %114 = tpu.matmul %112, %113, %cst_51 {dimension_numbers = #tpu.dot_dimension_numbers<[1], [0], [0], [1], [0, 0, 1, 1], [], []>} : vector<32x512xbf16>, vector<512x256xbf16>, vector<32x256xf32> -> vector<32x256xf32>
    %c0_52 = arith.constant 0 : index
    %c0_53 = arith.constant 0 : index
    %115 = vector.load %arg17[%c0_52, %c0_53] : memref<1x256xf32, #tpu.memory_space<vmem>>, vector<1x256xf32>
    %116 = vector.broadcast %115 : vector<1x256xf32> to vector<32x256xf32>
    %117 = arith.addf %114, %116 : vector<32x256xf32>
    %cst_54 = arith.constant 0.000000e+00 : f32
    %118 = vector.broadcast %cst_54 : f32 to vector<32x256xf32>
    %119 = arith.maximumf %117, %118 : vector<32x256xf32>
    %120 = arith.truncf %119 : vector<32x256xf32> to vector<32x256xbf16>
    %c0_55 = arith.constant 0 : index
    %c0_56 = arith.constant 0 : index
    %121 = vector.load %arg18[%c0_55, %c0_56] : memref<256x128xbf16, #tpu.memory_space<vmem>>, vector<256x128xbf16>
    %cst_57 = arith.constant dense<0.000000e+00> : vector<32x128xf32>
    %122 = tpu.matmul %120, %121, %cst_57 {dimension_numbers = #tpu.dot_dimension_numbers<[1], [0], [0], [1], [0, 0, 1, 1], [], []>} : vector<32x256xbf16>, vector<256x128xbf16>, vector<32x128xf32> -> vector<32x128xf32>
    %c0_58 = arith.constant 0 : index
    %c0_59 = arith.constant 0 : index
    %123 = vector.load %arg19[%c0_58, %c0_59] : memref<1x128xf32, #tpu.memory_space<vmem>>, vector<1x128xf32>
    %124 = vector.broadcast %123 : vector<1x128xf32> to vector<32x128xf32>
    %125 = arith.addf %122, %124 : vector<32x128xf32>
    %126 = vector.shape_cast %125 : vector<32x128xf32> to vector<2x16x128xf32>
    %cst_60 = arith.constant dense<0xFF800000> : vector<2x128xf32>
    %127 = vector.multi_reduction <maximumf>, %126, %cst_60 [1] : vector<2x16x128xf32> to vector<2x128xf32>
    %c0_61 = arith.constant 0 : index
    %c0_62 = arith.constant 0 : index
    %c0_63 = arith.constant 0 : index
    %128 = vector.load %arg20[%c0_61, %c0_62, %c0_63] : memref<1x2x128xf32, #tpu.memory_space<vmem>>, vector<1x2x128xf32>
    %129 = vector.shape_cast %128 : vector<1x2x128xf32> to vector<2x128xf32>
    %130 = vector.shape_cast %127 : vector<2x128xf32> to vector<1x2x128xf32>
    tpu.vector_store %arg20[%c0_61, %c0_62, %c0_63], %130 {strides = array<i32>} : memref<1x2x128xf32, #tpu.memory_space<vmem>>, vector<1x2x128xf32>,
    return
  }
  func.func @transform_0(%arg0: i32) -> (i32, i32) {
    %c0_i32 = arith.constant 0 : i32
    %c0_i32_0 = arith.constant 0 : i32
    return %arg0, %c0_i32 : i32, i32
  }
  func.func @transform_1(%arg0: i32) -> (i32, i32) {
    %c0_i32 = arith.constant 0 : i32
    %c0_i32_0 = arith.constant 0 : i32
    %c0_i32_1 = arith.constant 0 : i32
    return %c0_i32, %c0_i32_0 : i32, i32
  }
  func.func @transform_2(%arg0: i32) -> (i32, i32) {
    %c0_i32 = arith.constant 0 : i32
    %c0_i32_0 = arith.constant 0 : i32
    %c0_i32_1 = arith.constant 0 : i32
    return %c0_i32, %c0_i32_0 : i32, i32
  }
  func.func @transform_3(%arg0: i32) -> (i32, i32) {
    %c0_i32 = arith.constant 0 : i32
    %c0_i32_0 = arith.constant 0 : i32
    %c0_i32_1 = arith.constant 0 : i32
    return %c0_i32, %c0_i32_0 : i32, i32
  }
  func.func @transform_4(%arg0: i32) -> (i32, i32) {
    %c0_i32 = arith.constant 0 : i32
    %c0_i32_0 = arith.constant 0 : i32
    %c0_i32_1 = arith.constant 0 : i32
    return %c0_i32, %c0_i32_0 : i32, i32
  }
  func.func @transform_5(%arg0: i32) -> (i32, i32) {
    %c0_i32 = arith.constant 0 : i32
    %c0_i32_0 = arith.constant 0 : i32
    %c0_i32_1 = arith.constant 0 : i32
    return %c0_i32, %c0_i32_0 : i32, i32
  }
  func.func @transform_6(%arg0: i32) -> (i32, i32) {
    %c0_i32 = arith.constant 0 : i32
    %c0_i32_0 = arith.constant 0 : i32
    %c0_i32_1 = arith.constant 0 : i32
    return %c0_i32, %c0_i32_0 : i32, i32
  }
  func.func @transform_7(%arg0: i32) -> (i32, i32) {
    %c0_i32 = arith.constant 0 : i32
    %c0_i32_0 = arith.constant 0 : i32
    %c0_i32_1 = arith.constant 0 : i32
    return %c0_i32, %c0_i32_0 : i32, i32
  }
  func.func @transform_8(%arg0: i32) -> (i32, i32) {
    %c0_i32 = arith.constant 0 : i32
    %c0_i32_0 = arith.constant 0 : i32
    %c0_i32_1 = arith.constant 0 : i32
    return %c0_i32, %c0_i32_0 : i32, i32
  }
  func.func @transform_9(%arg0: i32) -> (i32, i32) {
    %c0_i32 = arith.constant 0 : i32
    %c0_i32_0 = arith.constant 0 : i32
    %c0_i32_1 = arith.constant 0 : i32
    return %c0_i32, %c0_i32_0 : i32, i32
  }
  func.func @transform_10(%arg0: i32) -> (i32, i32) {
    %c0_i32 = arith.constant 0 : i32
    %c0_i32_0 = arith.constant 0 : i32
    %c0_i32_1 = arith.constant 0 : i32
    return %c0_i32, %c0_i32_0 : i32, i32
  }
  func.func @transform_11(%arg0: i32) -> (i32, i32) {
    %c0_i32 = arith.constant 0 : i32
    %c0_i32_0 = arith.constant 0 : i32
    %c0_i32_1 = arith.constant 0 : i32
    return %c0_i32, %c0_i32_0 : i32, i32
  }
  func.func @transform_12(%arg0: i32) -> (i32, i32) {
    %c0_i32 = arith.constant 0 : i32
    %c0_i32_0 = arith.constant 0 : i32
    %c0_i32_1 = arith.constant 0 : i32
    return %c0_i32, %c0_i32_0 : i32, i32
  }
  func.func @transform_13(%arg0: i32) -> (i32, i32) {
    %c0_i32 = arith.constant 0 : i32
    %c0_i32_0 = arith.constant 0 : i32
    %c0_i32_1 = arith.constant 0 : i32
    return %c0_i32, %c0_i32_0 : i32, i32
  }
  func.func @transform_14(%arg0: i32) -> (i32, i32) {
    %c0_i32 = arith.constant 0 : i32
    %c0_i32_0 = arith.constant 0 : i32
    %c0_i32_1 = arith.constant 0 : i32
    return %c0_i32, %c0_i32_0 : i32, i32
  }
  func.func @transform_15(%arg0: i32) -> (i32, i32) {
    %c0_i32 = arith.constant 0 : i32
    %c0_i32_0 = arith.constant 0 : i32
    %c0_i32_1 = arith.constant 0 : i32
    return %c0_i32, %c0_i32_0 : i32, i32
  }
  func.func @transform_16(%arg0: i32) -> (i32, i32) {
    %c0_i32 = arith.constant 0 : i32
    %c0_i32_0 = arith.constant 0 : i32
    %c0_i32_1 = arith.constant 0 : i32
    return %c0_i32, %c0_i32_0 : i32, i32
  }
  func.func @transform_17(%arg0: i32) -> (i32, i32) {
    %c0_i32 = arith.constant 0 : i32
    %c0_i32_0 = arith.constant 0 : i32
    %c0_i32_1 = arith.constant 0 : i32
    return %c0_i32, %c0_i32_0 : i32, i32
  }
  func.func @transform_18(%arg0: i32) -> (i32, i32) {
    %c0_i32 = arith.constant 0 : i32
    %c0_i32_0 = arith.constant 0 : i32
    %c0_i32_1 = arith.constant 0 : i32
    return %c0_i32, %c0_i32_0 : i32, i32
  }
  func.func @transform_19(%arg0: i32) -> (i32, i32, i32) {
    %c0_i32 = arith.constant 0 : i32
    %c0_i32_0 = arith.constant 0 : i32
    %c0_i32_1 = arith.constant 0 : i32
    return %arg0, %c0_i32, %c0_i32_0 : i32, i32, i32
  }
  func.func @transform_20(%arg0: i32) -> (i32, i32, i32) {
    %c0_i32 = arith.constant 0 : i32
    %c0_i32_0 = arith.constant 0 : i32
    %c0_i32_1 = arith.constant 0 : i32
    return %arg0, %c0_i32, %c0_i32_0 : i32, i32, i32
  }
}

</mosaic_0001>

<bundles_post_ra>
// kernel: tpu_custom_call.1
= control target key start
LH: loop header
LB: loop body
LE: loop exit
PB: predicated region body
PF: predicated region fallthrough
CT: control target
= control target key end

     0   :  { %s4748_s0 = inlined_call_operand.vmem [shape: f32[32,3], index: 0, kind: input, shape index: {}]   ;;  %s4749_s1 = inlined_call_operand.vmem [shape: f32[3,128], index: 1, kind: input, shape index: {}]   ;;  %s4750_s2 = inlined_call_operand.vmem [shape: f32[1,128], index: 2, kind: input, shape index: {}]   ;;  %s4751_s3 = inlined_call_operand.hbm [shape: bf16[128,256], index: 3, kind: input, shape index: {}]   ;;  %s4752_s4 = inlined_call_operand.vmem [shape: f32[1,256], index: 4, kind: input, shape index: {}]   ;;  %s4753_s5 = inlined_call_operand.hbm [shape: bf16[256,512], index: 5, kind: input, shape index: {}]   ;;  %s4754_s6 = inlined_call_operand.vmem [shape: f32[1,512], index: 6, kind: input, shape index: {}]   ;;  %s4755_s7 = inlined_call_operand.hbm [shape: bf16[512,256], index: 7, kind: input, shape index: {}]   ;;  %s4756_s8 = inlined_call_operand.vmem [shape: f32[1,256], index: 8, kind: input, shape index: {}]   ;;  %s4757_s9 = inlined_call_operand.hbm [shape: bf16[256,128], index: 9, kind: input, shape index: {}]   ;;  %s4758_s10 = inlined_call_operand.vmem [shape: f32[1,128], index: 10, kind: input, shape index: {}]   ;;  %s4759_s11 = inlined_call_operand.hbm [shape: f32[128,128], index: 11, kind: input, shape index: {}]   ;;  %s4760_s12 = inlined_call_operand.vmem [shape: f32[1,128], index: 12, kind: input, shape index: {}]   ;;  %s4761_s13 = inlined_call_operand.vmem [shape: f32[3,512], index: 13, kind: input, shape index: {}]   ;;  %s4762_s14 = inlined_call_operand.vmem [shape: f32[1,512], index: 14, kind: input, shape index: {}]   ;;  %s4763_s15 = inlined_call_operand.hbm [shape: bf16[512,256], index: 15, kind: input, shape index: {}]   ;;  %s4764_s16 = inlined_call_operand.vmem [shape: f32[1,256], index: 16, kind: input, shape index: {}]   ;;  %s4765_s17 = inlined_call_operand.hbm [shape: bf16[256,128], index: 17, kind: input, shape index: {}]   ;;  %s4766_s18 = inlined_call_operand.vmem [shape: f32[1,128], index: 18, kind: input, shape index: {}]   ;;  %s4767_s19 = inlined_call_operand.hbm [shape: f32[1,2,128], index: 19, kind: output, shape index: {0}]   ;;  %s4768_s20 = inlined_call_operand.hbm [shape: f32[1,2,128], index: 20, kind: output, shape index: {1}]  }
   0x1   :  { %4773 = sst [smem:[#allocation23_spill]] %s4748_s0 }
   0x2   :  { %4774 = sst [smem:[#allocation24_spill]] %s4749_s1 }
   0x3   :  { %4775 = sst [smem:[#allocation25_spill]] %s4750_s2 }
   0x4   :  { %4776 = sst [smem:[#allocation26_spill]] %s4751_s3 }
   0x5   :  { %4777 = sst [smem:[#allocation27_spill]] %s4752_s4 }
   0x6   :  { %26 = vsyncpa [#allocation3], 0 }
   0x7   :  { %27 = vsyncpa [#allocation6], 0 }
   0x8   :  { %28 = vsyncpa [#allocation9], 0 }
   0x9   :  { %29 = vsyncpa [#allocation12], 0 }
   0xa   :  { %30 = vsyncpa [#allocation4], 0 }
   0xb   :  { %31 = vsyncpa [#allocation16], 0  ;;  %s4042_s1 = smov [#allocation5]   ;;  %s3832_s2 = scalar_lea.hbm %s4753_s5, 8192 }
   0xc   :  { %s57_s22 = sshll.u32 %s4042_s1, 4  ;;  %p3833_p0 = scmp.ne.s32.totalorder %s4753_s5, %s3832_s2  ;;  %s58_s22 = int_to_ptr.vmem [resolvable:$true] %s57_s22 }
   0xd   :  { %p3836_p1 = scmp.lt.u32.totalorder %s3832_s2, %s4753_s5 }
   0xf   :  { %p3838_p2 = pnand %p3836_p1, %p3833_p0 }
  0x11   :  { %3841 = shalt.err (!%p3838_p2)
}
  0x12   :  { %s3842_s28 = scalar_lea.vmem %s58_s22, 8192  ;;  %p3847_p4 = scmp.lt.s32.totalorder %s58_s22, %s58_s22 }
  0x13   :  { %p3843_p3 = scmp.ne.s32.totalorder %s58_s22, %s3842_s28  ;;  %p3848_p5 = scmp.lt.s32.totalorder %s3842_s28, %s3842_s28 }
  0x15   :  { %p3849_p6 = por %p3848_p5, %p3847_p4 }
  0x17   :  { %p3850_p7 = pnand %p3849_p6, %p3843_p3 }
  0x19   :  { %3853 = shalt.err (!%p3850_p7)
}
  0x1a   :  { %s4043_s4 = smov 256   ;;  %s4044_s29 = smov 16  }
  0x1b   :  { %63 = dma.hbm_to_vmem [thread:$0]  %s4753_s5, 8192, %s58_s22, [#allocation6], %s4043_s4, %s4043_s4, %s4044_s29  }
  0x1c   :  { %s4045_s21 = smov [#allocation8]   ;;  %s3854_s2 = scalar_lea.hbm %s4757_s9, 2048 }
  0x1d   :  { %s85_s1 = sshll.u32 %s4045_s21, 4  ;;  %p3855_p8 = scmp.ne.s32.totalorder %s4757_s9, %s3854_s2  ;;  %s86_s1 = int_to_ptr.vmem [resolvable:$true] %s85_s1 }
  0x1e   :  { %p3858_p9 = scmp.lt.u32.totalorder %s3854_s2, %s4757_s9 }
  0x20   :  { %p3860_p10 = pnand %p3858_p9, %p3855_p8 }
  0x22   :  { %3863 = shalt.err (!%p3860_p10)
}
  0x23   :  { %s3864_s28 = scalar_lea.vmem %s86_s1, 2048  ;;  %p3869_p12 = scmp.lt.s32.totalorder %s86_s1, %s86_s1 }
  0x24   :  { %p3865_p11 = scmp.ne.s32.totalorder %s86_s1, %s3864_s28  ;;  %p3870_p13 = scmp.lt.s32.totalorder %s3864_s28, %s3864_s28 }
  0x26   :  { %p3871_p0 = por %p3870_p13, %p3869_p12 }
  0x28   :  { %p3872_p1 = pnand %p3871_p0, %p3865_p11 }
  0x2a   :  { %3875 = shalt.err (!%p3872_p1)
}
  0x2b   :  { %s4772_s5 = smov 64   ;;  %s4047_s22 = smov 4  }
  0x2c   :  { %91 = dma.hbm_to_vmem [thread:$0]  %s4757_s9, 2048, %s86_s1, [#allocation9], %s4772_s5, %s4772_s5, %s4047_s22  }
  0x2d   :  { %s4048_s30 = smov [#allocation11]   ;;  %s4049_s21 = smov [#allocation2]  }
  0x2e   :  { %s117_s0 = sshll.u32 %s4048_s30, 4  ;;  %s43_s23 = sshll.u32 %s4049_s21, 4  ;;  %s118_s0 = int_to_ptr.vmem [resolvable:$true] %s117_s0  ;;  %s4202_s23 = int_to_ptr.vmem [resolvable:$true] %s43_s23 }
  0x2f   :  { %s3876_s25 = scalar_lea.hbm %s4763_s15, 8192 }
  0x30   :  { %p3877_p2 = scmp.ne.s32.totalorder %s4763_s15, %s3876_s25  ;;  %p3880_p3 = scmp.lt.u32.totalorder %s3876_s25, %s4763_s15 }
  0x32   :  { %p3882_p4 = pnand %p3880_p3, %p3877_p2 }
  0x34   :  { %3885 = shalt.err (!%p3882_p4)
}
  0x35   :  { %s3886_s9 = scalar_lea.vmem %s118_s0, 8192  ;;  %p3891_p6 = scmp.lt.s32.totalorder %s118_s0, %s118_s0 }
  0x36   :  { %p3887_p5 = scmp.ne.s32.totalorder %s118_s0, %s3886_s9  ;;  %p3892_p7 = scmp.lt.s32.totalorder %s3886_s9, %s3886_s9 }
  0x38   :  { %p3893_p8 = por %p3892_p7, %p3891_p6 }
  0x3a   :  { %p3894_p9 = pnand %p3893_p8, %p3887_p5 }
  0x3c   :  { %3897 = shalt.err (!%p3894_p9)
}
  0x3d   :  { %s4050_s1 = smov 128   ;;  %s4051_s4 = smov 8  }
  0x3e   :  { %123 = dma.hbm_to_vmem [thread:$0]  %s4763_s15, 8192, %s118_s0, [#allocation12], %s4050_s1, %s4050_s1, %s4051_s4  }
  0x3f   :  { %s4778_s2 = sld [smem:[#allocation26_spill]] }
  0x45   :  { %s3898_s25 = scalar_lea.hbm %s4778_s2, 2048 }
  0x46   :  { %p3899_p10 = scmp.ne.s32.totalorder %s4778_s2, %s3898_s25  ;;  %p3902_p11 = scmp.lt.u32.totalorder %s3898_s25, %s4778_s2 }
  0x48   :  { %p3904_p12 = pnand %p3902_p11, %p3899_p10 }
  0x4a   :  { %3907 = shalt.err (!%p3904_p12)
}
  0x4b   :  { %s3908_s9 = scalar_lea.vmem %s4202_s23, 2048  ;;  %p3913_p0 = scmp.lt.s32.totalorder %s4202_s23, %s4202_s23 }
  0x4c   :  { %p3909_p13 = scmp.ne.s32.totalorder %s4202_s23, %s3908_s9  ;;  %p3914_p1 = scmp.lt.s32.totalorder %s3908_s9, %s3908_s9 }
  0x4e   :  { %p3915_p2 = por %p3914_p1, %p3913_p0 }
  0x50   :  { %p3916_p3 = pnand %p3915_p2, %p3909_p13 }
  0x52   :  { %3919 = shalt.err (!%p3916_p3)
}
  0x53   :  { %49 = dma.hbm_to_vmem [thread:$0]  %s4778_s2, 2048, %s4202_s23, [#allocation3], %s4050_s1, %s4050_s1, %s4051_s4  }
  0x54   :  { %s4052_s29 = smov [#allocation7]   ;;  %s4053_s21 = smov [#allocation10]  }
  0x55   :  { %s71_s30 = sshll.u32 %s4052_s29, 4  ;;  %s99_s24 = sshll.u32 %s4053_s21, 4  ;;  %s72_s30 = int_to_ptr.vmem [resolvable:$true] %s71_s30  ;;  %s4239_s24 = int_to_ptr.vmem [resolvable:$true] %s99_s24 }
  0x56   :  { %s3920_s26 = scalar_lea.hbm %s4755_s7, 8192 }
  0x57   :  { %p3921_p4 = scmp.ne.s32.totalorder %s4755_s7, %s3920_s26  ;;  %p3924_p5 = scmp.lt.u32.totalorder %s3920_s26, %s4755_s7 }
  0x59   :  { %p3926_p6 = pnand %p3924_p5, %p3921_p4 }
  0x5b   :  { %3929 = shalt.err (!%p3926_p6)
}
  0x5c   :  { %s3930_s23 = scalar_lea.vmem %s72_s30, 8192  ;;  %p3935_p8 = scmp.lt.s32.totalorder %s72_s30, %s72_s30 }
  0x5d   :  { %p3931_p7 = scmp.ne.s32.totalorder %s72_s30, %s3930_s23  ;;  %p3936_p9 = scmp.lt.s32.totalorder %s3930_s23, %s3930_s23 }
  0x5f   :  { %p3937_p10 = por %p3936_p9, %p3935_p8 }
  0x61   :  { %p3938_p11 = pnand %p3937_p10, %p3931_p7 }
  0x63   :  { %3941 = shalt.err (!%p3938_p11)
}
  0x64   :  { %77 = dma.hbm_to_vmem [thread:$0]  %s4755_s7, 8192, %s72_s30, [#allocation6], %s4050_s1, %s4050_s1, %s4051_s4  }
  0x65   :  { %s3942_s5 = scalar_lea.hbm %s4759_s11, 2048 }
  0x66   :  { %p3943_p12 = scmp.ne.s32.totalorder %s4759_s11, %s3942_s5  ;;  %p3946_p13 = scmp.lt.u32.totalorder %s3942_s5, %s4759_s11 }
  0x68   :  { %p3948_p0 = pnand %p3946_p13, %p3943_p12 }
  0x6a   :  { %3951 = shalt.err (!%p3948_p0)
}
  0x6b   :  { %s3952_s27 = scalar_lea.vmem %s4239_s24, 2048  ;;  %p3957_p2 = scmp.lt.s32.totalorder %s4239_s24, %s4239_s24 }
  0x6c   :  { %p3953_p1 = scmp.ne.s32.totalorder %s4239_s24, %s3952_s27  ;;  %p3958_p3 = scmp.lt.s32.totalorder %s3952_s27, %s3952_s27 }
  0x6e   :  { %p3959_p4 = por %p3958_p3, %p3957_p2 }
  0x70   :  { %p3960_p5 = pnand %p3959_p4, %p3953_p1 }
  0x72   :  { %3963 = shalt.err (!%p3960_p5)
}
  0x73   :  { %105 = dma.hbm_to_vmem [thread:$0]  %s4759_s11, 2048, %s4239_s24, [#allocation9], %s4050_s1, %s4050_s1, %s4051_s4  }
  0x74   :  { %s4054_s28 = smov [#allocation13]   ;;  %s3964_s15 = scalar_lea.hbm %s4765_s17, 2048 }
  0x75   :  { %s131_s9 = sshll.u32 %s4054_s28, 4  ;;  %p3965_p6 = scmp.ne.s32.totalorder %s4765_s17, %s3964_s15  ;;  %s132_s9 = int_to_ptr.vmem [resolvable:$true] %s131_s9 }
  0x76   :  { %p3968_p7 = scmp.lt.u32.totalorder %s3964_s15, %s4765_s17 }
  0x78   :  { %p3970_p8 = pnand %p3968_p7, %p3965_p6 }
  0x7a   :  { %3973 = shalt.err (!%p3970_p8)
}
  0x7b   :  { %s3974_s25 = scalar_lea.vmem %s132_s9, 2048  ;;  %p3979_p10 = scmp.lt.s32.totalorder %s132_s9, %s132_s9 }
  0x7c   :  { %p3975_p9 = scmp.ne.s32.totalorder %s132_s9, %s3974_s25  ;;  %p3980_p11 = scmp.lt.s32.totalorder %s3974_s25, %s3974_s25 }
  0x7e   :  { %p3981_p12 = por %p3980_p11, %p3979_p10 }
  0x80   :  { %p3982_p13 = pnand %p3981_p12, %p3975_p9 }
  0x82   :  { %3985 = shalt.err (!%p3982_p13)
}
  0x83   :  { %s4779_s11 = smov 64  }
  0x84   :  { %137 = dma.hbm_to_vmem [thread:$0]  %s4765_s17, 2048, %s132_s9, [#allocation12], %s4779_s11, %s4779_s11, %s4047_s22  }
  0x85   :  { %4030 = dma.done.wait [#allocation3], 2048  }
  0x86   :  { %4031 = vsyncadd [#allocation3], 4294965248 }
  0x87   :  { %4032 = dma.done.wait [#allocation6], 16384  }
  0x88   :  { %4033 = vsyncadd [#allocation6], 4294950912 }
  0x89   :  { %4034 = dma.done.wait [#allocation9], 4096  }
  0x8a   :  { %4035 = vsyncadd [#allocation9], 4294963200 }
  0x8b   :  { %4036 = dma.done.wait [#allocation12], 10240  }
  0x8c   :  { %4037 = vsyncadd [#allocation12], 4294957056  ;;  %v4055_v0 = vmov 1   ;;  %v4056_v1 = vmov 0   ;;  %s4780_s26 = sld [smem:[#allocation23_spill]]  ;;  %v4057_v7 = vmov 2  }
  0x8d   :  { %3474 = vset.pattern.permute.xlu1 %v4055_v0  ;;  %3473 = vset.pattern.permute.xlu0 %v4056_v1  ;;  %v3484_v4 = vld [vmem:[#allocation2 + $0x4] ss:$8 sps:$4 sm:$0xff]   ;;  %v3486_v5 = vld [vmem:[#allocation2] ss:$8 sps:$4 sm:$0xff]   ;;  %v3487_v6 = vld [vmem:[#allocation2 + $0x14] ss:$8 sps:$4 sm:$0xff]  }
  0x8e   :  { %410 = vmatprep.mubr.bf16.mxu1 %v4056_v1  ;;  %378 = vmatprep.subr.bf16.mxu1 %v3484_v4  ;;  %v3489_v8 = vld [vmem:[#allocation2 + $0x10] ss:$8 sps:$4 sm:$0xff]   ;;  %v3490_v9 = vld [vmem:[#allocation2 + $0x24] ss:$8 sps:$4 sm:$0xff]   ;;  %v3492_v12 = vld [vmem:[#allocation2 + $0x20] ss:$8 sps:$4 sm:$0xff]  }
  0x8f   :  { %379 = vmatpush1.bf16.msra.mxu1 %v3486_v5  ;;  %v3493_v13 = vld [vmem:[#allocation2 + $0x34] ss:$8 sps:$4 sm:$0xff]   ;;  %v3495_v14 = vld [vmem:[#allocation2 + $0x30] ss:$8 sps:$4 sm:$0xff]   ;;  %v3496_v15 = vld [vmem:[#allocation2 + $0x44] ss:$8 sps:$4 sm:$0xff]  }
  0x90   :  { %380 = vmatprep.subr.bf16.mxu1 %v3487_v6  ;;  %v3498_v16 = vld [vmem:[#allocation2 + $0x40] ss:$8 sps:$4 sm:$0xff]   ;;  %v3499_v17 = vld [vmem:[#allocation2 + $0x54] ss:$8 sps:$4 sm:$0xff]   ;;  %v3501_v18 = vld [vmem:[#allocation2 + $0x50] ss:$8 sps:$4 sm:$0xff]  }
  0x91   :  { %v3502_v19 = vld [vmem:[#allocation2 + $0x64] ss:$8 sps:$4 sm:$0xff]   ;;  %v3504_v20 = vld [vmem:[#allocation2 + $0x60] ss:$8 sps:$4 sm:$0xff]   ;;  %v3505_v21 = vld [vmem:[#allocation2 + $0x74] ss:$8 sps:$4 sm:$0xff]  }
  0x92   :  { %v162_v2 = vld [vmem:[%s4780_s26] sm:$0xff]  ;;  %v163_v3 = vld [vmem:[%s4780_s26 + $0x8] sm:$0xff]  ;;  %v164_v10 = vld [vmem:[%s4780_s26 + $0x10] sm:$0xff]  ;;  %s4781_s2 = sld [smem:[#allocation24_spill]]  ;;  %s4782_s11 = sld [smem:[#allocation25_spill]]  ;;  %vm1127_vm0 = vcmask 1041409  }
  0x93   :  { %197 = vperm.xlu1 %3474, %v162_v2   ;;  %169 = vperm.xlu0 %3473, %v162_v2   ;;  %v165_v11 = vld [vmem:[%s4780_s26 + $0x18] sm:$0xff]  ;;  %v3510_v23 = vld [vmem:[#allocation5 + $0x4] ss:$16 sps:$4 sm:$0xff]   ;;  %s4783_s24 = sld [smem:[#allocation27_spill]]  ;;  %vm4059_vm1 = vmmov 0   ;;  %s4063_s28 = smov 126  }
  0x94   :  { %381 = vmatpush1.bf16.msra.mxu1 %v3489_v8  ;;  %v3507_v22 = vld [vmem:[#allocation2 + $0x70] ss:$8 sps:$4 sm:$0xff]   ;;  %v3511_v24 = vld [vmem:[#allocation5 + $0xc] ss:$16 sps:$4 sm:$0xff]   ;;  %s4065_s9 = smov 124   ;;  %s4066_s23 = smov 127  }
  0x95   :  { %382 = vmatprep.subr.bf16.mxu1 %v3490_v9  ;;  %v3513_v25 = vld [vmem:[#allocation5 + $0x8] ss:$16 sps:$4 sm:$0xff]   ;;  %902 = vmatprep.subr.bf16.mxu0 %v3511_v24  ;;  %v3517_v26 = vld [vmem:[#allocation5 + $0x2c] ss:$16 sps:$4 sm:$0xff]   ;;  %v3514_v24 = vld [vmem:[#allocation5 + $0x20] ss:$16 sps:$4 sm:$0xff]  }
  0x96   :  { %903 = vmatpush1.bf16.msra.mxu0 %v3513_v25  ;;  %v3519_v27 = vld [vmem:[#allocation5 + $0x28] ss:$16 sps:$4 sm:$0xff]   ;;  %v3523_v28 = vld [vmem:[#allocation5 + $0x4c] ss:$16 sps:$4 sm:$0xff]  }
  0x97   :  { %201 = vperm.xlu1 %3474, %v163_v3   ;;  %3475 = vset.pattern.permute.xlu0 %v4057_v7  ;;  %v3525_v29 = vld [vmem:[#allocation5 + $0x48] ss:$16 sps:$4 sm:$0xff]   ;;  %v3529_v30 = vld [vmem:[#allocation5 + $0x6c] ss:$16 sps:$4 sm:$0xff]  }
  0x98   :  { %226 = vperm.xlu0 %3475, %v162_v2   ;;  %383 = vmatpush1.bf16.msra.mxu1 %v3492_v12  ;;  %v3531_v31 = vld [vmem:[#allocation5 + $0x68] ss:$16 sps:$4 sm:$0xff]   ;;  %v3535_v32 = vld [vmem:[#allocation5 + $0x8c] ss:$16 sps:$4 sm:$0xff]   ;;  %v3049_v53 = vld [vmem:[%s4781_s2 + $0x1] ss:$0 sm:$0xff] }
  0x99   :  { %384 = vmatprep.subr.bf16.mxu1 %v3493_v13  ;;  %904 = vmatprep.subr.bf16.mxu0 %v3517_v26  ;;  %v3537_v33 = vld [vmem:[#allocation5 + $0x88] ss:$16 sps:$4 sm:$0xff]   ;;  %v3541_v34 = vld [vmem:[#allocation5 + $0xac] ss:$16 sps:$4 sm:$0xff]   ;;  %v3048_v54 = vld [vmem:[%s4781_s2] ss:$0 sm:$0xff] }
  0x9a   :  { %905 = vmatpush1.bf16.msra.mxu0 %v3519_v27  ;;  %v3543_v35 = vld [vmem:[#allocation5 + $0xa8] ss:$16 sps:$4 sm:$0xff]   ;;  %v3547_v36 = vld [vmem:[#allocation5 + $0xcc] ss:$16 sps:$4 sm:$0xff]   ;;  %v3050_v56 = vld [vmem:[%s4781_s2 + $0x2] ss:$0 sm:$0xff] }
  0x9b   :  { %3477 = vset.pattern.permute.xlu1 %v4057_v7  ;;  %906 = vmatprep.subr.bf16.mxu0 %v3523_v28  ;;  %v3549_v37 = vld [vmem:[#allocation5 + $0xc8] ss:$16 sps:$4 sm:$0xff]   ;;  %v3553_v38 = vld [vmem:[#allocation5 + $0xec] ss:$16 sps:$4 sm:$0xff]   ;;  %v3051_v4 = vld [vmem:[%s4782_s11] ss:$0 sm:$0xff] }
  0x9c   :  { %230 = vperm.xlu1 %3477, %v163_v3   ;;  %3476 = vset.pattern.permute.xlu0 %v4056_v1  ;;  %v3555_v39 = vld [vmem:[#allocation5 + $0xe8] ss:$16 sps:$4 sm:$0xff]   ;;  %v3559_v40 = vld [vmem:[#allocation5 + $0x10c] ss:$16 sps:$4 sm:$0xff]   ;;  %v3522_v26 = vld [vmem:[#allocation5 + $0x44] ss:$16 sps:$4 sm:$0xff]  }
  0x9d   :  { %174 = vperm.xlu0 %3476, %v163_v3   ;;  %385 = vmatpush1.bf16.msra.mxu1 %v3495_v14  ;;  %v3561_v41 = vld [vmem:[#allocation5 + $0x108] ss:$16 sps:$4 sm:$0xff]   ;;  %v3565_v42 = vld [vmem:[#allocation5 + $0x12c] ss:$16 sps:$4 sm:$0xff]   ;;  %s4067_s2 = smov 122  }
  0x9e   :  { %386 = vmatprep.subr.bf16.mxu1 %v3496_v15  ;;  %907 = vmatpush1.bf16.msra.mxu0 %v3525_v29  ;;  %v3567_v43 = vld [vmem:[#allocation5 + $0x128] ss:$16 sps:$4 sm:$0xff]   ;;  %v3571_v44 = vld [vmem:[#allocation5 + $0x14c] ss:$16 sps:$4 sm:$0xff]  }
  0x9f   :  { %908 = vmatprep.subr.bf16.mxu0 %v3529_v30  ;;  %v3573_v45 = vld [vmem:[#allocation5 + $0x148] ss:$16 sps:$4 sm:$0xff]   ;;  %v3577_v46 = vld [vmem:[#allocation5 + $0x16c] ss:$16 sps:$4 sm:$0xff]   ;;  %v3520_v30 = vld [vmem:[#allocation5 + $0x40] ss:$16 sps:$4 sm:$0xff]  }
  0xa0   :  { %3478 = vset.pattern.permute.xlu1 %v4056_v1  ;;  %v3579_v47 = vld [vmem:[#allocation5 + $0x168] ss:$16 sps:$4 sm:$0xff]   ;;  %v3583_v48 = vld [vmem:[#allocation5 + $0x18c] ss:$16 sps:$4 sm:$0xff]  }
  0xa1   :  { %179 = vperm.xlu1 %3478, %v164_v10   ;;  %184 = vperm.xlu0 %3476, %v165_v11   ;;  %v3585_v49 = vld [vmem:[#allocation5 + $0x188] ss:$16 sps:$4 sm:$0xff]   ;;  %v3589_v50 = vld [vmem:[#allocation5 + $0x1ac] ss:$16 sps:$4 sm:$0xff]  }
  0xa2   :  { %387 = vmatpush1.bf16.msra.mxu1 %v3498_v16  ;;  %909 = vmatpush1.bf16.msra.mxu0 %v3531_v31 }
  0xa3   :  { %388 = vmatprep.subr.bf16.mxu1 %v3499_v17  ;;  %910 = vmatprep.subr.bf16.mxu0 %v3535_v32  ;;  %v3508_v17 = vld [vmem:[#allocation5] ss:$16 sps:$4 sm:$0xff]  }
  0xa5   :  { %3479 = vset.pattern.permute.xlu1 %v4055_v0  ;;  %3480 = vset.pattern.permute.xlu0 %v4057_v7 }
  0xa6   :  { %205 = vperm.xlu1 %3479, %v164_v10   ;;  %234 = vperm.xlu0 %3480, %v164_v10  }
  0xa7   :  { %389 = vmatpush1.bf16.msra.mxu1 %v3501_v18  ;;  %911 = vmatpush1.bf16.msra.mxu0 %v3537_v33  ;;  %v3528_v33 = vld [vmem:[#allocation5 + $0x64] ss:$16 sps:$4 sm:$0xff]  }
  0xa8   :  { %390 = vmatprep.subr.bf16.mxu1 %v3502_v19  ;;  %912 = vmatprep.subr.bf16.mxu0 %v3541_v34 }
  0xaa   :  { %209 = vperm.xlu1 %3479, %v165_v11   ;;  %3483 = vset.pattern.permute.xlu0 %v4056_v1 }
  0xab   :  { %391 = vmatpush1.bf16.msra.mxu1 %v3504_v20  ;;  %913 = vmatpush1.bf16.msra.mxu0 %v3543_v35  ;;  %v3516_v20 = vld [vmem:[#allocation5 + $0x24] ss:$16 sps:$4 sm:$0xff]  }
  0xac   :  { %392 = vmatprep.subr.bf16.mxu1 %v3505_v21  ;;  %914 = vmatprep.subr.bf16.mxu0 %v3547_v36  ;;  %v3526_v36 = vld [vmem:[#allocation5 + $0x60] ss:$16 sps:$4 sm:$0xff]  }
  0xae   :  { %3481 = vset.pattern.permute.xlu1 %v4057_v7 }
  0xaf   :  { %238 = vperm.xlu1 %3481, %v165_v11   ;;  %393 = vmatpush1.bf16.msra.mxu1 %v3507_v22 }
  0xb0   :  { %849 = vmatprep.subr.bf16.mxu1 %v3510_v23  ;;  %915 = vmatpush1.bf16.msra.mxu0 %v3549_v37 }
  0xb1   :  { %916 = vmatprep.subr.bf16.mxu0 %v3553_v38 }
  0xb3   :  { %3482 = vset.pattern.permute.xlu1 %v4056_v1 }
  0xb4   :  { %917 = vmatpush1.bf16.msra.mxu0 %v3555_v39 }
  0xb5   :  { %918 = vmatprep.subr.bf16.mxu0 %v3559_v40  ;;  %v3532_v40 = vld [vmem:[#allocation5 + $0x80] ss:$16 sps:$4 sm:$0xff]  }
  0xb8   :  { %919 = vmatpush1.bf16.msra.mxu0 %v3561_v41 }
  0xb9   :  { %920 = vmatprep.subr.bf16.mxu0 %v3565_v42  ;;  %v3540_v42 = vld [vmem:[#allocation5 + $0xa4] ss:$16 sps:$4 sm:$0xff]  }
  0xbc   :  { %921 = vmatpush1.bf16.msra.mxu0 %v3567_v43  ;;  %v3538_v43 = vld [vmem:[#allocation5 + $0xa0] ss:$16 sps:$4 sm:$0xff]  }
  0xbd   :  { %922 = vmatprep.subr.bf16.mxu0 %v3571_v44  ;;  %v3546_v44 = vld [vmem:[#allocation5 + $0xc4] ss:$16 sps:$4 sm:$0xff]  }
  0xc0   :  { %923 = vmatpush1.bf16.msra.mxu0 %v3573_v45  ;;  %v3544_v45 = vld [vmem:[#allocation5 + $0xc0] ss:$16 sps:$4 sm:$0xff]  }
  0xc1   :  { %924 = vmatprep.subr.bf16.mxu0 %v3577_v46  ;;  %v3552_v46 = vld [vmem:[#allocation5 + $0xe4] ss:$16 sps:$4 sm:$0xff]  }
  0xc4   :  { %925 = vmatpush1.bf16.msra.mxu0 %v3579_v47  ;;  %v3550_v47 = vld [vmem:[#allocation5 + $0xe0] ss:$16 sps:$4 sm:$0xff]  }
  0xc5   :  { %926 = vmatprep.subr.bf16.mxu0 %v3583_v48  ;;  %v3558_v48 = vld [vmem:[#allocation5 + $0x104] ss:$16 sps:$4 sm:$0xff]  }
  0xc8   :  { %927 = vmatpush1.bf16.msra.mxu0 %v3585_v49  ;;  %v3556_v49 = vld [vmem:[#allocation5 + $0x100] ss:$16 sps:$4 sm:$0xff]  }
  0xc9   :  { %928 = vmatprep.subr.bf16.mxu0 %v3589_v50  ;;  %v3564_v50 = vld [vmem:[#allocation5 + $0x124] ss:$16 sps:$4 sm:$0xff]  }
 0x112   :  { %v198_v51 = vpop.permute.xlu1 %197  ;;  %v170_v52 = vpop.permute.xlu0 %169 }
 0x113   :  { %v216_v57 = vmul.f32 %v3049_v53, %v198_v51  ;;  %v191_v58 = vmul.f32 %v3048_v54, %v170_v52  ;;  %v3562_v51 = vld [vmem:[#allocation5 + $0x120] ss:$16 sps:$4 sm:$0xff]   ;;  %v3570_v52 = vld [vmem:[#allocation5 + $0x144] ss:$16 sps:$4 sm:$0xff]  }
 0x115   :  { %v220_v61 = vadd.f32 %v216_v57, %v191_v58  ;;  %v3580_v57 = vld [vmem:[#allocation5 + $0x180] ss:$16 sps:$4 sm:$0xff]   ;;  %v3588_v58 = vld [vmem:[#allocation5 + $0x1a4] ss:$16 sps:$4 sm:$0xff]  }
 0x116   :  { %v202_v55 = vpop.permute.xlu1 %201 }
 0x117   :  { %v227_v59 = vpop.permute.xlu0 %226  ;;  %v217_v0 = vmul.f32 %v3049_v53, %v202_v55  ;;  %v3574_v55 = vld [vmem:[#allocation5 + $0x160] ss:$16 sps:$4 sm:$0xff]  }
 0x118   :  { %v245_v60 = vmul.f32 %v3050_v56, %v227_v59  ;;  %v3586_v59 = vld [vmem:[#allocation5 + $0x1a0] ss:$16 sps:$4 sm:$0xff]  }
 0x11a   :  { %v249_v2 = vadd.f32 %v245_v60, %v220_v61  ;;  %v3591_v60 = vld [vmem:[#allocation5 + $0x1a8] ss:$16 sps:$4 sm:$0xff]   ;;  %v3594_v61 = vld [vmem:[#allocation5 + $0x1c4] ss:$16 sps:$4 sm:$0xff]  }
 0x11b   :  { %v231_v62 = vpop.permute.xlu1 %230  ;;  %929 = vmatpush1.bf16.msra.mxu0 %v3591_v60  ;;  %v3636_v60 = vld [vmem:[#allocation7 + $0xa4] ss:$8 sps:$4 sm:$0xff]  }
 0x11c   :  { %v175_v63 = vpop.permute.xlu0 %174  ;;  %v246_v5 = vmul.f32 %v3050_v56, %v231_v62  ;;  %v260_v9 = vadd.f32 %v3051_v4, %v249_v2  ;;  %v3595_v62 = vld [vmem:[#allocation5 + $0x1cc] ss:$16 sps:$4 sm:$0xff]   ;;  %v3600_v2 = vld [vmem:[#allocation5 + $0x1e4] ss:$16 sps:$4 sm:$0xff]  }
 0x11d   :  { %v192_v3 = vmul.f32 %v3048_v54, %v175_v63  ;;  %v3592_v63 = vld [vmem:[#allocation5 + $0x1c0] ss:$16 sps:$4 sm:$0xff]   ;;  %930 = vmatprep.subr.bf16.mxu0 %v3595_v62  ;;  %v3639_v62 = vld [vmem:[#allocation7 + $0xb4] ss:$8 sps:$4 sm:$0xff]  }
 0x11e   :  { %v264_v12 = vmax.f32 %v260_v9, 0.0 }
 0x11f   :  { %v221_v6 = vadd.f32 %v217_v0, %v192_v3  ;;  %v3597_v0 = vld [vmem:[#allocation5 + $0x1c8] ss:$16 sps:$4 sm:$0xff]   ;;  %v3601_v3 = vld [vmem:[#allocation5 + $0x1ec] ss:$16 sps:$4 sm:$0xff]  }
 0x120   :  { %v180_v7 = vpop.permute.xlu1 %179  ;;  %v185_v8 = vpop.permute.xlu0 %184  ;;  %931 = vmatpush1.bf16.msra.mxu0 %v3597_v0  ;;  %v3642_v0 = vld [vmem:[#allocation7 + $0xc4] ss:$8 sps:$4 sm:$0xff]  }
 0x121   :  { %v250_v10 = vadd.f32 %v246_v5, %v221_v6  ;;  %v193_v18 = vmul.f32 %v3048_v54, %v180_v7  ;;  %v194_v27 = vmul.f32 %v3048_v54, %v185_v8  ;;  %v3576_v54 = vld [vmem:[#allocation5 + $0x164] ss:$16 sps:$4 sm:$0xff]   ;;  %v3603_v5 = vld [vmem:[#allocation5 + $0x1e8] ss:$16 sps:$4 sm:$0xff]   ;;  %932 = vmatprep.subr.bf16.mxu0 %v3601_v3  ;;  %v288_v7 = vlaneseq }
 0x122   :  { %v3606_v6 = vld [vmem:[#allocation7 + $0x4] ss:$8 sps:$4 sm:$0xff]   ;;  %v3645_v3 = vld [vmem:[#allocation7 + $0xd4] ss:$8 sps:$4 sm:$0xff]  }
 0x123   :  { %v261_v11 = vadd.f32 %v3051_v4, %v250_v10  ;;  %v4322_v8 = vshrl.u32 %v288_v7, 7  ;;  %v286_v10 = vld [vmem:[%s4783_s24] sm:$0x3]  ;;  %v3649_v7 = vld [vmem:[#allocation7 + $0xf0] ss:$8 sps:$4 sm:$0xff]  }
 0x124   :  { %933 = vmatpush1.bf16.msra.mxu0 %v3603_v5  ;;  %v3648_v5 = vld [vmem:[#allocation7 + $0xe4] ss:$8 sps:$4 sm:$0xff]  }
 0x125   :  { %v206_v13 = vpop.permute.xlu1 %205  ;;  %v265_v14 = vmax.f32 %v261_v11, 0.0  ;;  %v235_v16 = vpop.permute.xlu0 %234  ;;  %v4325_v9 = vsub.s32 0, %v4322_v8  ;;  %v4331_v11 = vsub.s32 1, %v4322_v8 }
 0x126   :  { %v218_v15 = vmul.f32 %v3049_v53, %v206_v13  ;;  %v247_v22 = vmul.f32 %v3050_v56, %v235_v16 }
 0x127   :  { %v268_v19 = vpack.c.bf16 %v265_v14, %v264_v12  ;;  %v291_v12 = vrot.slane %v286_v10, %v4325_v9  ;;  %v295_v13 = vrot.slane %v286_v10, %v4331_v11  ;;  %v3651_v10 = vld [vmem:[#allocation7 + $0xf4] ss:$8 sps:$4 sm:$0xff]  }
 0x128   :  { %v222_v21 = vadd.f32 %v218_v15, %v193_v18 }
 0x129   :  { %v210_v23 = vpop.permute.xlu1 %209  ;;  %411 = vmatmul.mubr.bf16.vlgmr.msra.gmra.mrb[0].mxu1 %v268_v19 }
 0x12a   :  { %420 = vmatprep.mubr.bf16.mxu1 %v4056_v1  ;;  %850 = vmatpush1.bf16.msra.mxu1 %v3508_v17  ;;  %v219_v25 = vmul.f32 %v3049_v53, %v210_v23  ;;  %v251_v28 = vadd.f32 %v247_v22, %v222_v21  ;;  %v3534_v1 = vld [vmem:[#allocation5 + $0x84] ss:$16 sps:$4 sm:$0xff]   ;;  %v3568_v53 = vld [vmem:[#allocation5 + $0x140] ss:$16 sps:$4 sm:$0xff]  }
 0x12b   :  { %851 = vmatprep.subr.bf16.mxu1 %v3516_v20 }
 0x12c   :  { %v223_v31 = vadd.f32 %v219_v25, %v194_v27  ;;  %v262_v34 = vadd.f32 %v3051_v4, %v251_v28  ;;  %v3604_v28 = vld [vmem:[#allocation7] ss:$8 sps:$4 sm:$0xff]  }
 0x12e   :  { %v239_v29 = vpop.permute.xlu1 %238  ;;  %852 = vmatpush1.bf16.msra.mxu1 %v3514_v24  ;;  %v266_v38 = vmax.f32 %v262_v34, 0.0 }
 0x12f   :  { %v248_v32 = vmul.f32 %v3050_v56, %v239_v29  ;;  %853 = vmatprep.subr.bf16.mxu1 %v3522_v26  ;;  %v3582_v56 = vld [vmem:[#allocation5 + $0x184] ss:$16 sps:$4 sm:$0xff]  }
 0x130   :  { %v3609_v29 = vld [vmem:[#allocation7 + $0x14] ss:$8 sps:$4 sm:$0xff]  }
 0x131   :  { %v252_v35 = vadd.f32 %v248_v32, %v223_v31  ;;  %v3612_v31 = vld [vmem:[#allocation7 + $0x24] ss:$8 sps:$4 sm:$0xff]  }
 0x132   :  { %854 = vmatpush1.bf16.msra.mxu1 %v3520_v30  ;;  %v3607_v30 = vld [vmem:[#allocation7 + $0x10] ss:$8 sps:$4 sm:$0xff]  }
 0x133   :  { %v263_v37 = vadd.f32 %v3051_v4, %v252_v35  ;;  %855 = vmatprep.subr.bf16.mxu1 %v3528_v33  ;;  %v3598_v4 = vld [vmem:[#allocation5 + $0x1e0] ss:$16 sps:$4 sm:$0xff]  }
 0x134   :  { %v3610_v33 = vld [vmem:[#allocation7 + $0x20] ss:$8 sps:$4 sm:$0xff]  }
 0x135   :  { %v267_v39 = vmax.f32 %v263_v37, 0.0 }
 0x136   :  { %856 = vmatpush1.bf16.msra.mxu1 %v3526_v36  ;;  %v3615_v36 = vld [vmem:[#allocation7 + $0x34] ss:$8 sps:$4 sm:$0xff]  }
 0x137   :  { %v269_v41 = vpack.c.bf16 %v267_v39, %v266_v38  ;;  %857 = vmatprep.subr.bf16.mxu1 %v3534_v1 }
 0x139   :  { %421 = vmatmul.mubr.bf16.gmra.mrb[4].mxu1 %v269_v41  ;;  %v3613_v41 = vld [vmem:[#allocation7 + $0x30] ss:$8 sps:$4 sm:$0xff]  }
 0x13a   :  { %858 = vmatpush1.bf16.msra.mxu1 %v3532_v40 }
 0x13b   :  { %859 = vmatprep.subr.bf16.mxu1 %v3540_v42 }
 0x13e   :  { %860 = vmatpush1.bf16.msra.mxu1 %v3538_v43 }
 0x13f   :  { %861 = vmatprep.subr.bf16.mxu1 %v3546_v44  ;;  %v3618_v44 = vld [vmem:[#allocation7 + $0x44] ss:$8 sps:$4 sm:$0xff]  }
 0x142   :  { %862 = vmatpush1.bf16.msra.mxu1 %v3544_v45 }
 0x143   :  { %863 = vmatprep.subr.bf16.mxu1 %v3552_v46 }
 0x146   :  { %864 = vmatpush1.bf16.msra.mxu1 %v3550_v47 }
 0x147   :  { %865 = vmatprep.subr.bf16.mxu1 %v3558_v48 }
 0x14a   :  { %866 = vmatpush1.bf16.msra.mxu1 %v3556_v49  ;;  %v3616_v49 = vld [vmem:[#allocation7 + $0x40] ss:$8 sps:$4 sm:$0xff]  }
 0x14b   :  { %867 = vmatprep.subr.bf16.mxu1 %v3564_v50  ;;  %v3621_v50 = vld [vmem:[#allocation7 + $0x54] ss:$8 sps:$4 sm:$0xff]  }
 0x14e   :  { %868 = vmatpush1.bf16.msra.mxu1 %v3562_v51  ;;  %v3619_v51 = vld [vmem:[#allocation7 + $0x50] ss:$8 sps:$4 sm:$0xff]  }
 0x14f   :  { %869 = vmatprep.subr.bf16.mxu1 %v3570_v52  ;;  %v3624_v52 = vld [vmem:[#allocation7 + $0x64] ss:$8 sps:$4 sm:$0xff]  }
 0x152   :  { %870 = vmatpush1.bf16.msra.mxu1 %v3568_v53  ;;  %v3622_v53 = vld [vmem:[#allocation7 + $0x60] ss:$8 sps:$4 sm:$0xff]  }
 0x153   :  { %871 = vmatprep.subr.bf16.mxu1 %v3576_v54  ;;  %v3627_v54 = vld [vmem:[#allocation7 + $0x74] ss:$8 sps:$4 sm:$0xff]  }
 0x156   :  { %872 = vmatpush1.bf16.msra.mxu1 %v3574_v55  ;;  %v3625_v55 = vld [vmem:[#allocation7 + $0x70] ss:$8 sps:$4 sm:$0xff]  }
 0x157   :  { %873 = vmatprep.subr.bf16.mxu1 %v3582_v56  ;;  %v3630_v56 = vld [vmem:[#allocation7 + $0x84] ss:$8 sps:$4 sm:$0xff]  }
 0x15a   :  { %874 = vmatpush1.bf16.msra.mxu1 %v3580_v57  ;;  %v3628_v57 = vld [vmem:[#allocation7 + $0x80] ss:$8 sps:$4 sm:$0xff]  }
 0x15b   :  { %875 = vmatprep.subr.bf16.mxu1 %v3588_v58  ;;  %v3633_v58 = vld [vmem:[#allocation7 + $0x94] ss:$8 sps:$4 sm:$0xff]  }
 0x15e   :  { %876 = vmatpush1.bf16.msra.mxu1 %v3586_v59  ;;  %v3631_v59 = vld [vmem:[#allocation7 + $0x90] ss:$8 sps:$4 sm:$0xff]  }
 0x15f   :  { %877 = vmatprep.subr.bf16.mxu1 %v3594_v61  ;;  %v3634_v61 = vld [vmem:[#allocation7 + $0xa0] ss:$8 sps:$4 sm:$0xff]  }
 0x162   :  { %878 = vmatpush1.bf16.msra.mxu1 %v3592_v63  ;;  %v3637_v63 = vld [vmem:[#allocation7 + $0xb0] ss:$8 sps:$4 sm:$0xff]  }
 0x163   :  { %879 = vmatprep.subr.bf16.mxu1 %v3600_v2  ;;  %v3640_v2 = vld [vmem:[#allocation7 + $0xc0] ss:$8 sps:$4 sm:$0xff]  }
 0x166   :  { %880 = vmatpush1.bf16.msra.mxu1 %v3598_v4  ;;  %v3643_v4 = vld [vmem:[#allocation7 + $0xd0] ss:$8 sps:$4 sm:$0xff]  }
 0x167   :  { %1460 = vmatprep.subr.bf16.mxu1 %v3606_v6  ;;  %v3646_v6 = vld [vmem:[#allocation7 + $0xe0] ss:$8 sps:$4 sm:$0xff]  }
 0x1fc   :  { %v412_v14 = vpop.f32.mrb[0].mxu1 }
 0x1fd   :  { %v413_v15 = vadd.f32 %v412_v14, %v291_v12  ;;  %v414_v16 = vpop.f32.mrb[1].mxu1  ;;  %v3701_v14 = vld [vmem:[#allocation8] sm:$0xff]  }
 0x1fe   :  { %v415_v17 = vadd.f32 %v414_v16, %v295_v13  ;;  %v416_v18 = vpop.f32.mrb[2].mxu1  ;;  %v3703_v16 = vld [vmem:[#allocation8 + $0x8] sm:$0xff]  }
 0x1ff   :  { %v417_v19 = vadd.f32 %v416_v18, %v291_v12  ;;  %v418_v20 = vpop.f32.mrb[3].mxu1  ;;  %v431_v22 = vmax.f32 %v413_v15, 0.0  ;;  %v3702_v15 = vld [vmem:[#allocation8 + $0x48] sm:$0xff]   ;;  %v3705_v18 = vld [vmem:[#allocation8 + $0x10] sm:$0xff]  }
 0x200   :  { %v419_v21 = vadd.f32 %v418_v20, %v295_v13  ;;  %v432_v24 = vmax.f32 %v415_v17, 0.0  ;;  %v3704_v17 = vld [vmem:[#allocation8 + $0x50] sm:$0xff]   ;;  %v4336_v20 = vsub.s32 2, %v4322_v8 }
 0x201   :  { %v433_v23 = vmax.f32 %v417_v19, 0.0  ;;  %v3706_v19 = vld [vmem:[#allocation8 + $0x58] sm:$0xff]  }
 0x202   :  { %v434_v25 = vmax.f32 %v419_v21, 0.0  ;;  %v507_v21 = vld [vmem:[%s4754_s6] sm:$0xf] }
 0x203   :  { %v439_v26 = vpack.c.bf16 %v433_v23, %v431_v22  ;;  %v4342_v22 = vsub.s32 3, %v4322_v8  ;;  %v3707_v23 = vld [vmem:[#allocation8 + $0x18] sm:$0xff]  }
 0x204   :  { %v440_v27 = vpack.c.bf16 %v434_v25, %v432_v24  ;;  %v3708_v24 = vld [vmem:[#allocation8 + $0x60] sm:$0xff]   ;;  %v512_v25 = vrot.slane %v507_v21, %v4325_v9 }
 0x206   :  { %881 = vmatprep.mubr.bf16.mxu1 %v440_v27  ;;  %934 = vmatprep.mubr.bf16.mxu0 %v440_v27  ;;  %v4347_v27 = vrot.slane %v507_v21, %v4331_v11 }
 0x207   :  { %882 = vmatmul.mubr.bf16.vlgmr.msra.gmra.mrb[8].mxu1 %v439_v26  ;;  %935 = vmatmul.mubr.bf16.vlgmr.msra.gmra.mrb[0].mxu0 %v439_v26  ;;  %v520_v26 = vrot.slane %v507_v21, %v4336_v20 }
 0x208   :  { %1461 = vmatpush1.bf16.msra.mxu1 %v3604_v28  ;;  %v4350_v28 = vrot.slane %v507_v21, %v4342_v22 }
 0x209   :  { %1462 = vmatprep.subr.bf16.mxu1 %v3609_v29  ;;  %v3709_v29 = vld [vmem:[#allocation8 + $0x20] sm:$0xff]  }
 0x20c   :  { %v422_v32 = vpop.f32.mrb[4].mxu1  ;;  %1463 = vmatpush1.bf16.msra.mxu1 %v3607_v30 }
 0x20d   :  { %v423_v34 = vadd.f32 %v422_v32, %v291_v12  ;;  %v424_v35 = vpop.f32.mrb[5].mxu1  ;;  %1464 = vmatprep.subr.bf16.mxu1 %v3612_v31  ;;  %v3710_v32 = vld [vmem:[#allocation8 + $0x68] sm:$0xff]  }
 0x20e   :  { %v425_v37 = vadd.f32 %v424_v35, %v295_v13  ;;  %v426_v1 = vpop.f32.mrb[6].mxu1 }
 0x20f   :  { %v427_v38 = vadd.f32 %v426_v1, %v291_v12  ;;  %v428_v39 = vpop.f32.mrb[7].mxu1  ;;  %v435_v42 = vmax.f32 %v423_v34, 0.0  ;;  %v3654_v12 = vld [vmem:[#allocation7 + $0x104] ss:$8 sps:$4 sm:$0xff]  }
 0x210   :  { %v429_v40 = vadd.f32 %v428_v39, %v295_v13  ;;  %1465 = vmatpush1.bf16.msra.mxu1 %v3610_v33  ;;  %v436_v45 = vmax.f32 %v425_v37, 0.0  ;;  %v3700_v13 = vld [vmem:[#allocation8 + $0x40] sm:$0xff]  }
 0x211   :  { %v437_v43 = vmax.f32 %v427_v38, 0.0  ;;  %1466 = vmatprep.subr.bf16.mxu1 %v3615_v36  ;;  %3297 = vmatprep.subr.bf16.mxu0 %v3700_v13 }
 0x212   :  { %v438_v46 = vmax.f32 %v429_v40, 0.0  ;;  %3298 = vmatpush3.bf16.msra.mxu0 %v3701_v14 }
 0x213   :  { %v441_v47 = vpack.c.bf16 %v437_v43, %v435_v42  ;;  %3299 = vmatprep.subr.bf16.mxu0 %v3702_v15 }
 0x214   :  { %v442_v48 = vpack.c.bf16 %v438_v46, %v436_v45  ;;  %1467 = vmatpush1.bf16.msra.mxu1 %v3613_v41 }
 0x215   :  { %1468 = vmatprep.subr.bf16.mxu1 %v3618_v44  ;;  %v3711_v44 = vld [vmem:[#allocation8 + $0x28] sm:$0xff]  }
 0x216   :  { %891 = vmatprep.mubr.bf16.mxu1 %v442_v48  ;;  %944 = vmatprep.mubr.bf16.mxu0 %v442_v48 }
 0x217   :  { %892 = vmatmul.mubr.bf16.gmra.mrb[12].mxu1 %v441_v47  ;;  %945 = vmatmul.mubr.bf16.gmra.mrb[4].mxu0 %v441_v47 }
 0x218   :  { %1469 = vmatpush1.bf16.msra.mxu1 %v3616_v49  ;;  %3300 = vmatpush3.bf16.msra.mxu0 %v3703_v16 }
 0x219   :  { %1470 = vmatprep.subr.bf16.mxu1 %v3621_v50  ;;  %3301 = vmatprep.subr.bf16.mxu0 %v3704_v17 }
 0x21c   :  { %1471 = vmatpush1.bf16.msra.mxu1 %v3619_v51  ;;  %3302 = vmatpush3.bf16.msra.mxu0 %v3705_v18 }
 0x21d   :  { %1472 = vmatprep.subr.bf16.mxu1 %v3624_v52  ;;  %3303 = vmatprep.subr.bf16.mxu0 %v3706_v19 }
 0x220   :  { %1473 = vmatpush1.bf16.msra.mxu1 %v3622_v53  ;;  %3304 = vmatpush3.bf16.msra.mxu0 %v3707_v23 }
 0x221   :  { %1474 = vmatprep.subr.bf16.mxu1 %v3627_v54  ;;  %3305 = vmatprep.subr.bf16.mxu0 %v3708_v24 }
 0x224   :  { %1475 = vmatpush1.bf16.msra.mxu1 %v3625_v55  ;;  %3306 = vmatpush3.bf16.msra.mxu0 %v3709_v29 }
 0x225   :  { %1476 = vmatprep.subr.bf16.mxu1 %v3630_v56  ;;  %3307 = vmatprep.subr.bf16.mxu0 %v3710_v32 }
 0x228   :  { %1477 = vmatpush1.bf16.msra.mxu1 %v3628_v57  ;;  %3308 = vmatpush3.bf16.msra.mxu0 %v3711_v44 }
 0x229   :  { %1478 = vmatprep.subr.bf16.mxu1 %v3633_v58 }
 0x22c   :  { %1479 = vmatpush1.bf16.msra.mxu1 %v3631_v59 }
 0x22d   :  { %1480 = vmatprep.subr.bf16.mxu1 %v3636_v60 }
 0x230   :  { %1481 = vmatpush1.bf16.msra.mxu1 %v3634_v61 }
 0x231   :  { %1482 = vmatprep.subr.bf16.mxu1 %v3639_v62 }
 0x234   :  { %1483 = vmatpush1.bf16.msra.mxu1 %v3637_v63 }
 0x235   :  { %1484 = vmatprep.subr.bf16.mxu1 %v3642_v0 }
 0x238   :  { %1485 = vmatpush1.bf16.msra.mxu1 %v3640_v2 }
 0x239   :  { %1486 = vmatprep.subr.bf16.mxu1 %v3645_v3 }
 0x23c   :  { %1487 = vmatpush1.bf16.msra.mxu1 %v3643_v4 }
 0x23d   :  { %1488 = vmatprep.subr.bf16.mxu1 %v3648_v5 }
 0x240   :  { %1489 = vmatpush1.bf16.msra.mxu1 %v3646_v6 }
 0x241   :  { %1490 = vmatprep.subr.bf16.mxu1 %v3651_v10 }
 0x244   :  { %1491 = vmatpush1.bf16.msra.mxu1 %v3649_v7 }
 0x245   :  { %1501 = vmatprep.subr.bf16.mxu1 %v3654_v12 }
 0x2da   :  { %v883_v30 = vpop.f32.mrb[8].mxu1  ;;  %v936_v31 = vpop.f32.mrb[0].mxu0 }
 0x2db   :  { %v884_v33 = vadd.f32 %v883_v30, %v512_v25  ;;  %v937_v34 = vadd.f32 %v936_v31, %v520_v26  ;;  %v885_v35 = vpop.f32.mrb[9].mxu1  ;;  %v938_v36 = vpop.f32.mrb[1].mxu0 }
 0x2dc   :  { %v886_v37 = vadd.f32 %v885_v35, %v4347_v27  ;;  %v939_v1 = vadd.f32 %v938_v36, %v4350_v28  ;;  %v887_v38 = vpop.f32.mrb[10].mxu1  ;;  %v940_v39 = vpop.f32.mrb[2].mxu0 }
 0x2dd   :  { %v888_v40 = vadd.f32 %v887_v38, %v512_v25  ;;  %v941_v41 = vadd.f32 %v940_v39, %v520_v26  ;;  %v889_v42 = vpop.f32.mrb[11].mxu1  ;;  %v942_v43 = vpop.f32.mrb[3].mxu0  ;;  %v955_v47 = vmax.f32 %v884_v33, 0.0  ;;  %v957_v48 = vmax.f32 %v937_v34, 0.0 }
 0x2de   :  { %v890_v45 = vadd.f32 %v889_v42, %v4347_v27  ;;  %v943_v46 = vadd.f32 %v942_v43, %v4350_v28  ;;  %v956_v51 = vmax.f32 %v886_v37, 0.0  ;;  %v958_v52 = vmax.f32 %v939_v1, 0.0 }
 0x2df   :  { %v959_v49 = vmax.f32 %v888_v40, 0.0  ;;  %v961_v50 = vmax.f32 %v941_v41, 0.0 }
 0x2e0   :  { %v960_v53 = vmax.f32 %v890_v45, 0.0  ;;  %v962_v54 = vmax.f32 %v943_v46, 0.0 }
 0x2e1   :  { %v971_v55 = vmax.f32 %v955_v47, %v959_v49  ;;  %v985_v56 = vmax.f32 %v957_v48, %v961_v50 }
 0x2e2   :  { %v978_v57 = vmax.f32 %v956_v51, %v960_v53  ;;  %v992_v58 = vmax.f32 %v958_v52, %v962_v54 }
 0x2e3   :  { %v972_v59 = vrot.slane %v971_v55, 4  ;;  %v986_v60 = vrot.slane %v985_v56, 4 }
 0x2e4   :  { %v979_v61 = vrot.slane %v978_v57, 4  ;;  %v993_v62 = vrot.slane %v992_v58, 4 }
 0x2e5   :  { %v973_v2 = vmax.f32 %v971_v55, %v972_v59  ;;  %v987_v3 = vmax.f32 %v985_v56, %v986_v60 }
 0x2e6   :  { %v980_v6 = vmax.f32 %v978_v57, %v979_v61  ;;  %v994_v7 = vmax.f32 %v992_v58, %v993_v62 }
 0x2e7   :  { %v974_v19 = vrot.slane %v973_v2, 2  ;;  %v988_v21 = vrot.slane %v987_v3, 2 }
 0x2e8   :  { %v981_v29 = vrot.slane %v980_v6, 2  ;;  %v995_v30 = vrot.slane %v994_v7, 2 }
 0x2e9   :  { %v975_v40 = vmax.f32 %v973_v2, %v974_v19  ;;  %v989_v41 = vmax.f32 %v987_v3, %v988_v21 }
 0x2ea   :  { %v893_v63 = vpop.f32.mrb[12].mxu1  ;;  %v946_v0 = vpop.f32.mrb[4].mxu0 }
 0x2eb   :  { %v895_v4 = vpop.f32.mrb[13].mxu1  ;;  %v948_v5 = vpop.f32.mrb[5].mxu0  ;;  %v894_v13 = vadd.f32 %v893_v63, %v512_v25  ;;  %v947_v14 = vadd.f32 %v946_v0, %v520_v26  ;;  %v976_v48 = vrot.slane %v975_v40, 1  ;;  %v990_v49 = vrot.slane %v989_v41, 1 }
 0x2ec   :  { %v897_v10 = vpop.f32.mrb[14].mxu1  ;;  %v950_v12 = vpop.f32.mrb[6].mxu0  ;;  %v896_v17 = vadd.f32 %v895_v4, %v4347_v27  ;;  %v949_v18 = vadd.f32 %v948_v5, %v4350_v28 }
 0x2ed   :  { %v899_v15 = vpop.f32.mrb[15].mxu1  ;;  %v952_v16 = vpop.f32.mrb[7].mxu0  ;;  %v898_v23 = vadd.f32 %v897_v10, %v512_v25  ;;  %v951_v24 = vadd.f32 %v950_v12, %v520_v26  ;;  %v963_v33 = vmax.f32 %v894_v13, 0.0  ;;  %v965_v34 = vmax.f32 %v947_v14, 0.0 }
 0x2ee   :  { %v900_v31 = vadd.f32 %v899_v15, %v4347_v27  ;;  %v953_v32 = vadd.f32 %v952_v16, %v4350_v28  ;;  %v964_v37 = vmax.f32 %v896_v17, 0.0  ;;  %v966_v1 = vmax.f32 %v949_v18, 0.0 }
 0x2ef   :  { %v967_v35 = vmax.f32 %v898_v23, 0.0  ;;  %v969_v36 = vmax.f32 %v951_v24, 0.0  ;;  %v982_v25 = vmax.f32 %v980_v6, %v981_v29  ;;  %v996_v26 = vmax.f32 %v994_v7, %v995_v30 }
 0x2f0   :  { %v968_v38 = vmax.f32 %v900_v31, 0.0  ;;  %v970_v39 = vmax.f32 %v953_v32, 0.0  ;;  %v977_v60 = vmax.f32 %v975_v40, %v976_v48  ;;  %v991_v61 = vmax.f32 %v989_v41, %v990_v49  ;;  %v3664_v48 = vld [vmem:[#allocation7 + $0x140] ss:$8 sps:$4 sm:$0xff]   ;;  %v3669_v49 = vld [vmem:[#allocation7 + $0x154] ss:$8 sps:$4 sm:$0xff]  }
 0x2f1   :  { %v999_v42 = vmax.f32 %v963_v33, %v967_v35  ;;  %v1013_v43 = vmax.f32 %v965_v34, %v969_v36  ;;  %v983_v52 = vrot.slane %v982_v25, 1  ;;  %v997_v53 = vrot.slane %v996_v26, 1 }
 0x2f2   :  { %v1006_v44 = vmax.f32 %v964_v37, %v968_v38  ;;  %v1020_v45 = vmax.f32 %v966_v1, %v970_v39  ;;  %v1027_v12 = vpack.c.bf16 %v977_v60, %v977_v60  ;;  %v1029_v13 = vpack.c.bf16 %v991_v61, %v991_v61  ;;  %v3682_v60 = vld [vmem:[#allocation7 + $0x1a0] ss:$8 sps:$4 sm:$0xff]   ;;  %v3687_v61 = vld [vmem:[#allocation7 + $0x1b4] ss:$8 sps:$4 sm:$0xff]  }
 0x2f3   :  { %v1000_v46 = vrot.slane %v999_v42, 4  ;;  %v1014_v27 = vrot.slane %v1013_v43, 4  ;;  %v984_v0 = vmax.f32 %v982_v25, %v983_v52  ;;  %v998_v2 = vmax.f32 %v996_v26, %v997_v53  ;;  %v3657_v25 = vld [vmem:[#allocation7 + $0x114] ss:$8 sps:$4 sm:$0xff]   ;;  %v3670_v52 = vld [vmem:[#allocation7 + $0x160] ss:$8 sps:$4 sm:$0xff]  }
 0x2f4   :  { %v1007_v47 = vrot.slane %v1006_v44, 4  ;;  %v1021_v28 = vrot.slane %v1020_v45, 4  ;;  %v1119_v30 = vunpack.c.l.b16 %v1027_v12  ;;  %v1121_v31 = vunpack.c.l.b16 %v1029_v13  ;;  %v3675_v53 = vld [vmem:[#allocation7 + $0x174] ss:$8 sps:$4 sm:$0xff]  }
 0x2f5   :  { %v1001_v50 = vmax.f32 %v999_v42, %v1000_v46  ;;  %v1015_v51 = vmax.f32 %v1013_v43, %v1014_v27  ;;  %v1028_v18 = vpack.c.bf16 %v984_v0, %v984_v0  ;;  %v1030_v19 = vpack.c.bf16 %v998_v2, %v998_v2  ;;  %v3652_v42 = vld [vmem:[#allocation7 + $0x100] ss:$8 sps:$4 sm:$0xff]   ;;  %v3663_v27 = vld [vmem:[#allocation7 + $0x134] ss:$8 sps:$4 sm:$0xff]  }
 0x2f6   :  { %v1008_v54 = vmax.f32 %v1006_v44, %v1007_v47  ;;  %v1022_v55 = vmax.f32 %v1020_v45, %v1021_v28  ;;  %v3655_v44 = vld [vmem:[#allocation7 + $0x110] ss:$8 sps:$4 sm:$0xff]   ;;  %v3660_v45 = vld [vmem:[#allocation7 + $0x124] ss:$8 sps:$4 sm:$0xff]   ;;  %v3658_v46 = vld [vmem:[#allocation7 + $0x120] ss:$8 sps:$4 sm:$0xff]  }
 0x2f7   :  { %v1002_v56 = vrot.slane %v1001_v50, 2  ;;  %v1016_v57 = vrot.slane %v1015_v51, 2  ;;  %v1120_v34 = vunpack.c.l.b16 %v1028_v18  ;;  %v1122_v36 = vunpack.c.l.b16 %v1030_v19  ;;  %v3661_v47 = vld [vmem:[#allocation7 + $0x130] ss:$8 sps:$4 sm:$0xff]   ;;  %v3666_v28 = vld [vmem:[#allocation7 + $0x144] ss:$8 sps:$4 sm:$0xff]  }
 0x2f8   :  { %v1009_v58 = vrot.slane %v1008_v54, 2  ;;  %v1023_v59 = vrot.slane %v1022_v55, 2  ;;  %v3688_v0 = vld [vmem:[#allocation7 + $0x1c0] ss:$8 sps:$4 sm:$0xff]   ;;  %v3693_v2 = vld [vmem:[#allocation7 + $0x1d4] ss:$8 sps:$4 sm:$0xff]  }
 0x2f9   :  { %v1003_v62 = vmax.f32 %v1001_v50, %v1002_v56  ;;  %v1017_v63 = vmax.f32 %v1015_v51, %v1016_v57  ;;  %v3667_v50 = vld [vmem:[#allocation7 + $0x150] ss:$8 sps:$4 sm:$0xff]   ;;  %v3672_v51 = vld [vmem:[#allocation7 + $0x164] ss:$8 sps:$4 sm:$0xff]   ;;  %v3676_v56 = vld [vmem:[#allocation7 + $0x180] ss:$8 sps:$4 sm:$0xff]  }
 0x2fa   :  { %v1010_v3 = vmax.f32 %v1008_v54, %v1009_v58  ;;  %v1024_v4 = vmax.f32 %v1022_v55, %v1023_v59  ;;  %v3673_v54 = vld [vmem:[#allocation7 + $0x170] ss:$8 sps:$4 sm:$0xff]   ;;  %v3678_v55 = vld [vmem:[#allocation7 + $0x184] ss:$8 sps:$4 sm:$0xff]   ;;  %v3681_v57 = vld [vmem:[#allocation7 + $0x194] ss:$8 sps:$4 sm:$0xff]  }
 0x2fb   :  { %v1004_v5 = vrot.slane %v1003_v62, 1  ;;  %v1018_v6 = vrot.slane %v1017_v63, 1  ;;  %v3679_v58 = vld [vmem:[#allocation7 + $0x190] ss:$8 sps:$4 sm:$0xff]   ;;  %v3684_v59 = vld [vmem:[#allocation7 + $0x1a4] ss:$8 sps:$4 sm:$0xff]  }
 0x2fc   :  { %v1011_v7 = vrot.slane %v1010_v3, 1  ;;  %v1025_v10 = vrot.slane %v1024_v4, 1  ;;  %v3712_v12 = vld [vmem:[#allocation8 + $0x70] sm:$0xff]  }
 0x2fd   :  { %v1005_v14 = vmax.f32 %v1003_v62, %v1004_v5  ;;  %v1019_v15 = vmax.f32 %v1017_v63, %v1018_v6  ;;  %v3685_v62 = vld [vmem:[#allocation7 + $0x1b0] ss:$8 sps:$4 sm:$0xff]   ;;  %v3690_v63 = vld [vmem:[#allocation7 + $0x1c4] ss:$8 sps:$4 sm:$0xff]   ;;  %v3694_v5 = vld [vmem:[#allocation7 + $0x1e0] ss:$8 sps:$4 sm:$0xff]   ;;  %3309 = vmatprep.subr.bf16.mxu0 %v3712_v12 }
 0x2fe   :  { %v1012_v16 = vmax.f32 %v1010_v3, %v1011_v7  ;;  %v1026_v17 = vmax.f32 %v1024_v4, %v1025_v10  ;;  %v3691_v3 = vld [vmem:[#allocation7 + $0x1d0] ss:$8 sps:$4 sm:$0xff]   ;;  %v3696_v4 = vld [vmem:[#allocation7 + $0x1e4] ss:$8 sps:$4 sm:$0xff]   ;;  %v3699_v6 = vld [vmem:[#allocation7 + $0x1f4] ss:$8 sps:$4 sm:$0xff]  }
 0x2ff   :  { %v1031_v21 = vpack.c.bf16 %v1005_v14, %v1005_v14  ;;  %v1033_v23 = vpack.c.bf16 %v1019_v15, %v1019_v15  ;;  %v3697_v7 = vld [vmem:[#allocation7 + $0x1f0] ss:$8 sps:$4 sm:$0xff]  }
 0x300   :  { %v1032_v24 = vpack.c.bf16 %v1012_v16, %v1012_v16  ;;  %v1034_v29 = vpack.c.bf16 %v1026_v17, %v1026_v17  ;;  %v3713_v13 = vld [vmem:[#allocation8 + $0x30] sm:$0xff]   ;;  %v3714_v14 = vld [vmem:[#allocation8 + $0x78] sm:$0xff]   ;;  %v4058_v16 = vmov 0.0|0.0   ;;  %v1099_v17 = vld [vmem:[%s4756_s8] sm:$0x3] }
 0x301   :  { %v1123_v32 = vunpack.c.l.b16 %v1031_v21  ;;  %v1125_v33 = vunpack.c.l.b16 %v1033_v23  ;;  %3310 = vmatpush3.bf16.msra.mxu0 %v3713_v13  ;;  %v3715_v15 = vld [vmem:[#allocation8 + $0x38] sm:$0xff]   ;;  %v1104_v18 = vrot.slane %v1099_v17, %v4325_v9  ;;  %v1108_v19 = vrot.slane %v1099_v17, %v4331_v11 }
 0x302   :  { %v1124_v35 = vunpack.c.l.b16 %v1032_v24  ;;  %v1126_v37 = vunpack.c.l.b16 %v1034_v29  ;;  %3311 = vmatprep.subr.bf16.mxu0 %v3714_v14 }
 0x303   :  { %v1128_v1 = vsel %vm1127_vm0, %v1123_v32, %v1119_v30  ;;  %v4362_v38 = vsel %vm1127_vm0, %v1125_v33, %v1121_v31  ;;  %v1722_v33 = vld [vmem:[#allocation10] sm:$0xff] }
 0x304   :  { %v1129_v39 = vsel %vm1127_vm0, %v1124_v35, %v1120_v34  ;;  %v1131_v40 = vsel %vm1127_vm0, %v1126_v37, %v1122_v36  ;;  %v1132_v43 = vpack.c.b16 %v1128_v1, %v1128_v1  ;;  %v1134_v10 = vpack.c.b16 %v4362_v38, %v4362_v38  ;;  %v1723_v34 = vld [vmem:[#allocation10 + $0x8] sm:$0xff]  ;;  %v1724_v38 = vld [vmem:[#allocation10 + $0x10] sm:$0xff] }
 0x305   :  { %v1133_v41 = vpack.c.b16 %v1129_v39, %v1129_v39  ;;  %v1135_v26 = vpack.c.b16 %v1131_v40, %v1131_v40  ;;  %3312 = vmatpush3.bf16.msra.mxu0 %v3715_v15  ;;  %v3400_v37 = vpack.c.bf16 %v1723_v34, %v1722_v33  ;;  %v1725_v39 = vld [vmem:[#allocation10 + $0x18] sm:$0xff] }
 0x306   :  { %3399 = vmatprep.subr.bf16.mxu0 %v4058_v16  ;;  %v3403_v40 = vpack.c.bf16 %v1725_v39, %v1724_v38 }
 0x307   :  { %1492 = vmatprep.mubr.bf16.mxu1 %v1133_v41  ;;  %v1726_v41 = vld [vmem:[#allocation10 + $0x20] sm:$0xff] }
 0x308   :  { %1493 = vmatmul.mubr.bf16.vlgmr.msra.gmra.mrb[16].mxu1 %v1132_v43 }
 0x309   :  { %1502 = vmatpush1.bf16.msra.mxu1 %v3652_v42  ;;  %1533 = vmatprep.mubr.bf16.mxu1 %v1135_v26  ;;  %v1727_v42 = vld [vmem:[#allocation10 + $0x28] sm:$0xff]  ;;  %v1729_v26 = vld [vmem:[#allocation10 + $0x38] sm:$0xff] }
 0x30a   :  { %1503 = vmatprep.subr.bf16.mxu1 %v3657_v25  ;;  %v3406_v43 = vpack.c.bf16 %v1727_v42, %v1726_v41  ;;  %v1728_v25 = vld [vmem:[#allocation10 + $0x30] sm:$0xff] }
 0x30b   :  { %v4443_v41 = vld [vmem:[%s4780_s26 + $0x10] sm:$0xff] }
 0x30d   :  { %1504 = vmatpush1.bf16.msra.mxu1 %v3655_v44  ;;  %v3409_v44 = vpack.c.bf16 %v1729_v26, %v1728_v25  ;;  %v4456_v26 = vld [vmem:[%s4780_s26 + $0x18] sm:$0xff] }
 0x30e   :  { %1505 = vmatprep.subr.bf16.mxu1 %v3660_v45  ;;  %v1730_v45 = vld [vmem:[#allocation10 + $0x40] sm:$0xff] }
 0x311   :  { %1506 = vmatpush1.bf16.msra.mxu1 %v3658_v46  ;;  %v1731_v46 = vld [vmem:[#allocation10 + $0x48] sm:$0xff] }
 0x312   :  { %1507 = vmatprep.subr.bf16.mxu1 %v3663_v27  ;;  %v3412_v27 = vpack.c.bf16 %v1731_v46, %v1730_v45 }
 0x315   :  { %1508 = vmatpush1.bf16.msra.mxu1 %v3661_v47  ;;  %v1732_v47 = vld [vmem:[#allocation10 + $0x50] sm:$0xff] }
 0x316   :  { %1509 = vmatprep.subr.bf16.mxu1 %v3666_v28  ;;  %v1733_v28 = vld [vmem:[#allocation10 + $0x58] sm:$0xff] }
 0x319   :  { %1510 = vmatpush1.bf16.msra.mxu1 %v3664_v48  ;;  %v3415_v48 = vpack.c.bf16 %v1733_v28, %v1732_v47 }
 0x31a   :  { %1511 = vmatprep.subr.bf16.mxu1 %v3669_v49  ;;  %v1734_v49 = vld [vmem:[#allocation10 + $0x60] sm:$0xff] }
 0x31d   :  { %1512 = vmatpush1.bf16.msra.mxu1 %v3667_v50  ;;  %v1735_v50 = vld [vmem:[#allocation10 + $0x68] sm:$0xff] }
 0x31e   :  { %1513 = vmatprep.subr.bf16.mxu1 %v3672_v51  ;;  %v3418_v51 = vpack.c.bf16 %v1735_v50, %v1734_v49  ;;  %v3716_v49 = vld [vmem:[#allocation11] ss:$8 sps:$4 sm:$0xff]   ;;  %v3718_v50 = vld [vmem:[#allocation11 + $0x4] ss:$8 sps:$4 sm:$0xff]  }
 0x321   :  { %1514 = vmatpush1.bf16.msra.mxu1 %v3670_v52  ;;  %v1736_v52 = vld [vmem:[#allocation10 + $0x70] sm:$0xff] }
 0x322   :  { %1515 = vmatprep.subr.bf16.mxu1 %v3675_v53  ;;  %v1737_v53 = vld [vmem:[#allocation10 + $0x78] sm:$0xff] }
 0x325   :  { %1516 = vmatpush1.bf16.msra.mxu1 %v3673_v54  ;;  %v3421_v54 = vpack.c.bf16 %v1737_v53, %v1736_v52  ;;  %v3721_v52 = vld [vmem:[#allocation11 + $0x14] ss:$8 sps:$4 sm:$0xff]  }
 0x326   :  { %1517 = vmatprep.subr.bf16.mxu1 %v3678_v55  ;;  %v4060_v55 = vmov 0.0  }
 0x329   :  { %1518 = vmatpush1.bf16.msra.mxu1 %v3676_v56 }
 0x32a   :  { %1519 = vmatprep.subr.bf16.mxu1 %v3681_v57  ;;  %v3196_v57 = vld [vmem:[%s4758_s10] ss:$0 sm:$0xff]  ;;  %s4062_s10 = smov 125  }
 0x32d   :  { %1520 = vmatpush1.bf16.msra.mxu1 %v3679_v58 }
 0x32e   :  { %1521 = vmatprep.subr.bf16.mxu1 %v3684_v59 }
 0x331   :  { %1522 = vmatpush1.bf16.msra.mxu1 %v3682_v60 }
 0x332   :  { %1523 = vmatprep.subr.bf16.mxu1 %v3687_v61 }
 0x335   :  { %1524 = vmatpush1.bf16.msra.mxu1 %v3685_v62 }
 0x336   :  { %1525 = vmatprep.subr.bf16.mxu1 %v3690_v63 }
 0x339   :  { %1526 = vmatpush1.bf16.msra.mxu1 %v3688_v0  ;;  %v4061_v0 = vmov 1966171168  }
 0x33a   :  { %1527 = vmatprep.subr.bf16.mxu1 %v3693_v2  ;;  %v1818_v2 = vunpack.c.l.s4 %v4061_v0  ;;  %v3731_v0 = vld [vmem:[#allocation11 + $0x50] ss:$8 sps:$4 sm:$0xff]  }
 0x33d   :  { %1528 = vmatpush1.bf16.msra.mxu1 %v3691_v3  ;;  %v1819_v3 = vunpack.c.0.s8 %v1818_v2  ;;  %v3736_v2 = vld [vmem:[#allocation11 + $0x64] ss:$8 sps:$4 sm:$0xff]  }
 0x33e   :  { %1529 = vmatprep.subr.bf16.mxu1 %v3696_v4  ;;  %v3213_v4 = vld [vmem:[%s4760_s12] ss:$0 sm:$0xff]  ;;  %s4064_s12 = smov 123  }
 0x341   :  { %1530 = vmatpush1.bf16.msra.mxu1 %v3694_v5  ;;  %v1822_v5 = vsub.s32 %v1819_v3, %v4322_v8  ;;  %v3734_v3 = vld [vmem:[#allocation11 + $0x60] ss:$8 sps:$4 sm:$0xff]  }
 0x342   :  { %1531 = vmatprep.subr.bf16.mxu1 %v3699_v6 }
 0x345   :  { %1532 = vmatpush1.bf16.msra.mxu1 %v3697_v7 }
 0x348   :  { %1534 = vmatmul.mubr.bf16.vlgmr.msra.gmra.mrb[16].mxu1 %v1134_v10 }
 0x41b   :  { %v1535_v21 = vpop.f32.mrb[16].mxu1 }
 0x41c   :  { %v3423_v23 = vadd.f32 %v1535_v21, %v1104_v18  ;;  %v1537_v24 = vpop.f32.mrb[17].mxu1  ;;  %v4403_v18 = vld [vmem:[%s4780_s26] sm:$0xff]  ;;  %v4411_v21 = vld [vmem:[%s4780_s26 + $0x8] sm:$0xff] }
 0x41d   :  { %v3424_v29 = vadd.f32 %v1537_v24, %v1108_v19  ;;  %v1539_v30 = vpop.f32.mrb[18].mxu1 }
 0x41e   :  { %v1542_v31 = vmax.f32 %v3423_v23, 0.0  ;;  %v1540_v32 = vpop.f32.mrb[19].mxu1 }
 0x41f   :  { %v1543_v35 = vmax.f32 %v3424_v29, 0.0 }
 0x420   :  { %v1544_v1 = vpack.c.bf16 %v1542_v31, %v1542_v31 }
 0x421   :  { %v1545_v36 = vpack.c.bf16 %v1543_v35, %v1543_v35 }
 0x423   :  { %1713 = vmatprep.mubr.bf16.mxu0 %v1545_v36 }
 0x424   :  { %1714 = vmatmul.mubr.bf16.vlgmr.msra.gmra.mrb[8].mxu0 %v1544_v1 }
 0x425   :  { %3401 = vmatpush3.bf16.msra.mxu0 %v3400_v37  ;;  %3396 = vmatprep.mubr.msk.f32.mxu0 %vm4059_vm1, %v4060_v55 }
 0x426   :  { %3402 = vmatprep.subr.bf16.mxu0 %v4058_v16 }
 0x429   :  { %3404 = vmatpush3.bf16.msra.mxu0 %v3403_v40 }
 0x42a   :  { %3405 = vmatprep.subr.bf16.mxu0 %v4058_v16 }
 0x42d   :  { %3407 = vmatpush3.bf16.msra.mxu0 %v3406_v43 }
 0x42e   :  { %3408 = vmatprep.subr.bf16.mxu0 %v4058_v16 }
 0x431   :  { %3410 = vmatpush3.bf16.msra.mxu0 %v3409_v44 }
 0x432   :  { %3411 = vmatprep.subr.bf16.mxu0 %v4058_v16 }
 0x435   :  { %3413 = vmatpush3.bf16.msra.mxu0 %v3412_v27 }
 0x436   :  { %3414 = vmatprep.subr.bf16.mxu0 %v4058_v16 }
 0x439   :  { %3416 = vmatpush3.bf16.msra.mxu0 %v3415_v48 }
 0x43a   :  { %3417 = vmatprep.subr.bf16.mxu0 %v4058_v16 }
 0x43d   :  { %3419 = vmatpush3.bf16.msra.mxu0 %v3418_v51 }
 0x43e   :  { %3420 = vmatprep.subr.bf16.mxu0 %v4058_v16 }
 0x441   :  { %3422 = vmatpush3.bf16.msra.mxu0 %v3421_v54  ;;  %v3719_v54 = vld [vmem:[#allocation11 + $0x10] ss:$8 sps:$4 sm:$0xff]  }
 0x442   :  { %2695 = vmatprep.subr.bf16.mxu0 %v3718_v50 }
 0x4f7   :  { %v3313_v56 = vpop.f32.mrb[8].mxu0 }
 0x4f8   :  { %v3314_v58 = vpop.f32.mrb[9].mxu0 }
 0x4f9   :  { %v3315_v59 = vadd.f32 %v3314_v58, %v3313_v56  ;;  %v3316_v60 = vpop.f32.mrb[10].mxu0  ;;  %v3724_v56 = vld [vmem:[#allocation11 + $0x24] ss:$8 sps:$4 sm:$0xff]  }
 0x4fa   :  { %v3317_v61 = vpop.f32.mrb[11].mxu0  ;;  %v3725_v60 = vld [vmem:[#allocation11 + $0x30] ss:$8 sps:$4 sm:$0xff]  }
 0x4fb   :  { %v1716_v62 = vadd.f32 %v3315_v59, %v3196_v57  ;;  %v3722_v57 = vld [vmem:[#allocation11 + $0x20] ss:$8 sps:$4 sm:$0xff]   ;;  %v3727_v59 = vld [vmem:[#allocation11 + $0x34] ss:$8 sps:$4 sm:$0xff]   ;;  %v3730_v61 = vld [vmem:[#allocation11 + $0x44] ss:$8 sps:$4 sm:$0xff]  }
 0x4fd   :  { %v1721_v63 = vmax.f32 %v1716_v62, 0.0  ;;  %v3728_v62 = vld [vmem:[#allocation11 + $0x40] ss:$8 sps:$4 sm:$0xff]  }
 0x4ff   :  { %3397 = vmatmul.mubr.f32.vlgmr.msra.gmra.mrb[12].mxu0 %v1721_v63  ;;  %v3733_v63 = vld [vmem:[#allocation11 + $0x54] ss:$8 sps:$4 sm:$0xff]  }
 0x500   :  { %2696 = vmatpush1.bf16.msra.mxu0 %v3716_v49  ;;  %v3752_v49 = vld [vmem:[#allocation11 + $0xc0] ss:$8 sps:$4 sm:$0xff]  }
 0x501   :  { %2697 = vmatprep.subr.bf16.mxu0 %v3721_v52 }
 0x504   :  { %2698 = vmatpush1.bf16.msra.mxu0 %v3719_v54 }
 0x505   :  { %2699 = vmatprep.subr.bf16.mxu0 %v3724_v56 }
 0x508   :  { %2700 = vmatpush1.bf16.msra.mxu0 %v3722_v57 }
 0x509   :  { %2701 = vmatprep.subr.bf16.mxu0 %v3727_v59  ;;  %v3758_v59 = vld [vmem:[#allocation11 + $0xe0] ss:$8 sps:$4 sm:$0xff]  }
 0x50c   :  { %2702 = vmatpush1.bf16.msra.mxu0 %v3725_v60 }
 0x50d   :  { %2703 = vmatprep.subr.bf16.mxu0 %v3730_v61 }
 0x510   :  { %2704 = vmatpush1.bf16.msra.mxu0 %v3728_v62  ;;  %v3761_v62 = vld [vmem:[#allocation11 + $0xf0] ss:$8 sps:$4 sm:$0xff]  }
 0x511   :  { %2705 = vmatprep.subr.bf16.mxu0 %v3733_v63 }
 0x514   :  { %2706 = vmatpush1.bf16.msra.mxu0 %v3731_v0 }
 0x515   :  { %2707 = vmatprep.subr.bf16.mxu0 %v3736_v2 }
 0x518   :  { %2708 = vmatpush1.bf16.msra.mxu0 %v3734_v3  ;;  %v3766_v3 = vld [vmem:[#allocation11 + $0x104] ss:$8 sps:$4 sm:$0xff]  }
 0x5d2   :  { %v1811_v6 = vpop.f32.mrb[12].mxu0 }
 0x5d3   :  { %v1812_v7 = vadd.f32 %v3213_v4, %v1811_v6  ;;  %v3398_v10 = vpop.f32.mrb[13].mxu0  ;;  %v3739_v4 = vld [vmem:[#allocation11 + $0x74] ss:$8 sps:$4 sm:$0xff]   ;;  %v3742_v6 = vld [vmem:[#allocation11 + $0x84] ss:$8 sps:$4 sm:$0xff]  }
 0x5d4   :  { %2709 = vmatprep.subr.bf16.mxu0 %v3739_v4  ;;  %v3745_v10 = vld [vmem:[#allocation11 + $0x94] ss:$8 sps:$4 sm:$0xff]  }
 0x5d5   :  { %v1823_v12 = vrot.slane %v1812_v7, %v1822_v5  ;;  %1815 = vst [vmem:[#allocation15] sm:$0x3] %v1812_v7  ;;  %v3740_v7 = vld [vmem:[#allocation11 + $0x80] ss:$8 sps:$4 sm:$0xff]  }
 0x5d7   :  { %v1831_v13 = vrot.slane %v1823_v12, %v1822_v5  ;;  %v1824_v15 = vcombine.high %v1823_v12, %v1823_v12  ;;  %v3743_v12 = vld [vmem:[#allocation11 + $0x90] ss:$8 sps:$4 sm:$0xff]  }
 0x5d9   :  { %v4381_v14 = vrot.slane %v1831_v13, %v4325_v9  ;;  %v1838_v8 = vrot.slane %v1824_v15, %v1822_v5  ;;  %v3737_v5 = vld [vmem:[#allocation11 + $0x70] ss:$8 sps:$4 sm:$0xff]   ;;  %v3748_v13 = vld [vmem:[#allocation11 + $0xa4] ss:$8 sps:$4 sm:$0xff]   ;;  %v3746_v15 = vld [vmem:[#allocation11 + $0xa0] ss:$8 sps:$4 sm:$0xff]  }
 0x5da   :  { %2710 = vmatpush1.bf16.msra.mxu0 %v3737_v5 }
 0x5db   :  { %1981 = vrot.lane.b32.xlu0 %v4381_v14, %s4062_s10  ;;  %1853 = vrot.lane.b32.xlu1 %v4381_v14, %s4063_s28  ;;  %v4392_v16 = vrot.slane %v1838_v8, %v4325_v9 }
 0x5dc   :  { %2711 = vmatprep.subr.bf16.mxu0 %v3742_v6 }
 0x5dd   :  { %v1851_v61 = vmul.f32 %v4443_v41, %v4392_v16  ;;  %v1852_v5 = vmul.f32 %v4456_v26, %v4392_v16 }
 0x5de   :  { %2712 = vmatpush1.bf16.msra.mxu0 %v3740_v7 }
 0x5df   :  { %2011 = vrot.lane.b32.xlu0 %v4381_v14, %s4064_s12  ;;  %1883 = vrot.lane.b32.xlu1 %v4381_v14, %s4065_s9 }
 0x5e0   :  { %2713 = vmatprep.subr.bf16.mxu0 %v3745_v10 }
 0x5e2   :  { %2714 = vmatpush1.bf16.msra.mxu0 %v3743_v12 }
 0x5e3   :  { %1971 = vrot.lane.b32.xlu0 %v4381_v14, %s4066_s23  ;;  %2132 = vrot.lane.b32.xlu1 %v4381_v14, %s4067_s2 }
 0x5e4   :  { %2715 = vmatprep.subr.bf16.mxu0 %v3748_v13 }
 0x5e6   :  { %2716 = vmatpush1.bf16.msra.mxu0 %v3746_v15 }
 0x5e7   :  { %1983 = vrot.lane.b32.xlu1 %v4392_v16, %s4062_s10  ;;  %1855 = vrot.lane.b32.xlu0 %v4392_v16, %s4063_s28 }
 0x5eb   :  { %2013 = vrot.lane.b32.xlu1 %v4392_v16, %s4064_s12  ;;  %1885 = vrot.lane.b32.xlu0 %v4392_v16, %s4065_s9 }
 0x5ef   :  { %2134 = vrot.lane.b32.xlu1 %v4392_v16, %s4067_s2 }
 0x64d   :  { %v1854_v17 = vpop.permute.xlu1 %1853  ;;  %v1982_v24 = vpop.permute.xlu0 %1981 }
 0x64e   :  { %v4406_v19 = vmul.f32 %v4403_v18, %v1854_v17  ;;  %v4414_v23 = vmul.f32 %v4411_v21, %v1854_v17  ;;  %v1987_v29 = vmul.f32 %v4403_v18, %v1982_v24  ;;  %v1988_v30 = vmul.f32 %v4411_v21, %v1982_v24 }
 0x650   :  { %1869 = vrot.lane.b32.xlu1 %v4414_v23, %s4066_s23  ;;  %1867 = vrot.lane.b32.xlu0 %v4406_v19, %s4066_s23 }
 0x651   :  { %v1884_v31 = vpop.permute.xlu1 %1883  ;;  %v2012_v34 = vpop.permute.xlu0 %2011 }
 0x652   :  { %v1889_v32 = vmul.f32 %v4403_v18, %v1884_v31  ;;  %v1890_v33 = vmul.f32 %v4411_v21, %v1884_v31  ;;  %v2017_v35 = vmul.f32 %v4403_v18, %v2012_v34  ;;  %v2018_v36 = vmul.f32 %v4411_v21, %v2012_v34 }
 0x653   :  { %v1849_v31 = vmul.f32 %v4403_v18, %v4381_v14 }
 0x654   :  { %1997 = vrot.lane.b32.xlu1 %v1988_v30, %s4066_s23  ;;  %1995 = vrot.lane.b32.xlu0 %v1987_v29, %s4066_s23  ;;  %v1850_v30 = vmul.f32 %v4411_v21, %v4381_v14 }
 0x655   :  { %v4432_v37 = vpop.permute.xlu0 %1971  ;;  %v2133_v1 = vpop.permute.xlu1 %2132 }
 0x656   :  { %v2138_v38 = vmul.f32 %v4403_v18, %v2133_v1  ;;  %v2139_v39 = vmul.f32 %v4411_v21, %v2133_v1 }
 0x658   :  { %1899 = vrot.lane.b32.xlu1 %v1890_v33, %s4063_s28  ;;  %1897 = vrot.lane.b32.xlu0 %v1889_v32, %s4063_s28 }
 0x659   :  { %v1856_v40 = vpop.permute.xlu0 %1855  ;;  %v1984_v43 = vpop.permute.xlu1 %1983 }
 0x65a   :  { %v4446_v42 = vmul.f32 %v4443_v41, %v1856_v40  ;;  %v1989_v25 = vmul.f32 %v4443_v41, %v1984_v43  ;;  %v4459_v44 = vmul.f32 %v4456_v26, %v1856_v40  ;;  %v1990_v46 = vmul.f32 %v4456_v26, %v1984_v43 }
 0x65c   :  { %2027 = vrot.lane.b32.xlu1 %v2018_v36, %s4063_s28  ;;  %2025 = vrot.lane.b32.xlu0 %v2017_v35, %s4063_s28  ;;  %v1977_v36 = vmul.f32 %v4403_v18, %v4432_v37  ;;  %v3754_v18 = vld [vmem:[#allocation11 + $0xc4] ss:$8 sps:$4 sm:$0xff]  }
 0x65d   :  { %v1886_v45 = vpop.permute.xlu0 %1885  ;;  %v2014_v47 = vpop.permute.xlu1 %2013 }
 0x65e   :  { %v1891_v27 = vmul.f32 %v4443_v41, %v1886_v45  ;;  %v2019_v28 = vmul.f32 %v4443_v41, %v2014_v47  ;;  %v1892_v48 = vmul.f32 %v4456_v26, %v1886_v45  ;;  %v2020_v51 = vmul.f32 %v4456_v26, %v2014_v47  ;;  %v3751_v45 = vld [vmem:[#allocation11 + $0xb4] ss:$8 sps:$4 sm:$0xff]  }
 0x65f   :  { %2717 = vmatprep.subr.bf16.mxu0 %v3751_v45  ;;  %v3821_v45 = vld [vmem:[#allocation13 + $0x20] sm:$0xff]  }
 0x660   :  { %2118 = vrot.lane.b32.xlu1 %v1890_v33, %s4066_s23  ;;  %2116 = vrot.lane.b32.xlu0 %v1889_v32, %s4066_s23 }
 0x661   :  { %v2135_v53 = vpop.permute.xlu1 %2134 }
 0x662   :  { %v2140_v55 = vmul.f32 %v4443_v41, %v2135_v53  ;;  %v2141_v58 = vmul.f32 %v4456_v26, %v2135_v53 }
 0x664   :  { %2148 = vrot.lane.b32.xlu1 %v2139_v39, %s4063_s28  ;;  %2146 = vrot.lane.b32.xlu0 %v2138_v38, %s4063_s28 }
 0x668   :  { %1973 = vrot.lane.b32.xlu0 %v4392_v16, %s4066_s23  ;;  %1871 = vrot.lane.b32.xlu1 %v4446_v42, %s4066_s23 }
 0x66c   :  { %1873 = vrot.lane.b32.xlu0 %v4459_v44, %s4066_s23  ;;  %1999 = vrot.lane.b32.xlu1 %v1989_v25, %s4066_s23  ;;  %v3749_v25 = vld [vmem:[#allocation11 + $0xb0] ss:$8 sps:$4 sm:$0xff]  }
 0x66d   :  { %2718 = vmatpush1.bf16.msra.mxu0 %v3749_v25  ;;  %v3819_v25 = vld [vmem:[#allocation13 + $0x18] sm:$0xff]  }
 0x66e   :  { %2719 = vmatprep.subr.bf16.mxu0 %v3754_v18 }
 0x670   :  { %2001 = vrot.lane.b32.xlu0 %v1990_v46, %s4066_s23  ;;  %1901 = vrot.lane.b32.xlu1 %v1891_v27, %s4063_s28  ;;  %v1978_v46 = vmul.f32 %v4411_v21, %v4432_v37  ;;  %v3757_v21 = vld [vmem:[#allocation11 + $0xd4] ss:$8 sps:$4 sm:$0xff]  }
 0x671   :  { %2720 = vmatpush1.bf16.msra.mxu0 %v3752_v49 }
 0x672   :  { %2721 = vmatprep.subr.bf16.mxu0 %v3757_v21  ;;  %v4535_v21 = vld [vmem:[%s4761_s13 + $0x2] ss:$4 sm:$0xf] }
 0x674   :  { %1903 = vrot.lane.b32.xlu0 %v1892_v48, %s4063_s28  ;;  %2029 = vrot.lane.b32.xlu1 %v2019_v28, %s4063_s28 }
 0x678   :  { %2031 = vrot.lane.b32.xlu0 %v2020_v51, %s4063_s28  ;;  %2120 = vrot.lane.b32.xlu1 %v1891_v27, %s4066_s23 }
 0x67c   :  { %2122 = vrot.lane.b32.xlu0 %v1892_v48, %s4066_s23  ;;  %2150 = vrot.lane.b32.xlu1 %v2140_v55, %s4063_s28  ;;  %v3755_v55 = vld [vmem:[#allocation11 + $0xd0] ss:$8 sps:$4 sm:$0xff]  }
 0x67d   :  { %2722 = vmatpush1.bf16.msra.mxu0 %v3755_v55 }
 0x680   :  { %2152 = vrot.lane.b32.xlu0 %v2141_v58, %s4063_s28  ;;  %v3760_v58 = vld [vmem:[#allocation11 + $0xe4] ss:$8 sps:$4 sm:$0xff]  }
 0x681   :  { %2723 = vmatprep.subr.bf16.mxu0 %v3760_v58 }
 0x682   :  { %2724 = vmatpush1.bf16.msra.mxu0 %v3758_v59  ;;  %v4555_v59 = vrot.slane %v4535_v21, %v4325_v9 }
 0x6c2   :  { %v1870_v8 = vpop.permute.xlu1 %1869  ;;  %v1868_v17 = vpop.permute.xlu0 %1867 }
 0x6c3   :  { %v1880_v32 = vadd.f32 %v1870_v8, %v1850_v30  ;;  %v1879_v33 = vadd.f32 %v1868_v17, %v1849_v31 }
 0x6c6   :  { %v1998_v24 = vpop.permute.xlu1 %1997  ;;  %v1996_v29 = vpop.permute.xlu0 %1995 }
 0x6c7   :  { %v2007_v39 = vadd.f32 %v1996_v29, %v1977_v36  ;;  %v2008_v27 = vadd.f32 %v1998_v24, %v1978_v46  ;;  %v3822_v46 = vld [vmem:[#allocation13 + $0x68] sm:$0xff]  }
 0x6ca   :  { %v1900_v34 = vpop.permute.xlu1 %1899  ;;  %v1898_v35 = vpop.permute.xlu0 %1897 }
 0x6cb   :  { %v1910_v1 = vadd.f32 %v1900_v34, %v1880_v32  ;;  %v1909_v38 = vadd.f32 %v1898_v35, %v1879_v33 }
 0x6cd   :  { %1921 = vperm.xlu0 %3483, %v1910_v1   ;;  %1916 = vperm.xlu1 %3482, %v1909_v38   ;;  %v3813_v1 = vld [vmem:[#allocation13] sm:$0xff]   ;;  %v3814_v38 = vld [vmem:[#allocation13 + $0x48] sm:$0xff]  }
 0x6ce   :  { %v2028_v40 = vpop.permute.xlu1 %2027  ;;  %v2026_v43 = vpop.permute.xlu0 %2025 }
 0x6cf   :  { %v2037_v14 = vadd.f32 %v2026_v43, %v2007_v39  ;;  %v2038_v48 = vadd.f32 %v2028_v40, %v2008_v27  ;;  %v3815_v39 = vld [vmem:[#allocation13 + $0x8] sm:$0xff]   ;;  %v3816_v40 = vld [vmem:[#allocation13 + $0x50] sm:$0xff]   ;;  %v3818_v43 = vld [vmem:[#allocation13 + $0x58] sm:$0xff]  }
 0x6d1   :  { %2045 = vperm.xlu1 %3482, %v2037_v14   ;;  %v4501_v14 = vld [vmem:[%s4761_s13] ss:$4 sm:$0xf] }
 0x6d2   :  { %v2119_v47 = vpop.permute.xlu1 %2118  ;;  %v2117_v28 = vpop.permute.xlu0 %2116  ;;  %v4505_v27 = vrot.slane %v4501_v14, %v4336_v20  ;;  %v4547_v55 = vrot.slane %v4501_v14, %v4331_v11 }
 0x6d3   :  { %v2129_v50 = vadd.f32 %v2119_v47, %v4414_v23  ;;  %v2128_v51 = vadd.f32 %v2117_v28, %v4406_v19  ;;  %v3763_v19 = vld [vmem:[#allocation11 + $0xf4] ss:$8 sps:$4 sm:$0xff]   ;;  %v4510_v47 = vld [vmem:[%s4761_s13 + $0x1] ss:$4 sm:$0xf] }
 0x6d4   :  { %2725 = vmatprep.subr.bf16.mxu0 %v3763_v19  ;;  %v4520_v49 = vrot.slane %v4510_v47, %v4336_v20 }
 0x6d5   :  { %2050 = vperm.xlu1 %3482, %v2038_v48   ;;  %2726 = vmatpush1.bf16.msra.mxu0 %v3761_v62 }
 0x6d6   :  { %v2149_v52 = vpop.permute.xlu1 %2148  ;;  %v2147_v53 = vpop.permute.xlu0 %2146  ;;  %2748 = vmatprep.subr.bf16.mxu0 %v3766_v3 }
 0x6d7   :  { %v2159_v37 = vadd.f32 %v2149_v52, %v2129_v50  ;;  %v2158_v54 = vadd.f32 %v2147_v53, %v2128_v51  ;;  %v4526_v51 = vrot.slane %v4510_v47, %v4325_v9 }
 0x6d9   :  { %2171 = vperm.xlu1 %3482, %v2159_v37   ;;  %2166 = vperm.xlu0 %3483, %v2158_v54   ;;  %v4539_v37 = vrot.slane %v4501_v14, %v4325_v9  ;;  %v4543_v54 = vrot.slane %v4510_v47, %v4331_v11 }
 0x6da   :  { %v1872_v56 = vpop.permute.xlu1 %1871  ;;  %v1974_v57 = vpop.permute.xlu0 %1973 }
 0x6db   :  { %v1881_v63 = vadd.f32 %v1872_v56, %v1851_v61  ;;  %v1979_v4 = vmul.f32 %v4443_v41, %v1974_v57  ;;  %v1980_v15 = vmul.f32 %v4456_v26, %v1974_v57  ;;  %v3812_v26 = vld [vmem:[#allocation13 + $0x40] sm:$0xff]  }
 0x6dc   :  { %3336 = vmatprep.subr.bf16.mxu1 %v3812_v26 }
 0x6dd   :  { %3337 = vmatpush3.bf16.msra.mxu1 %v3813_v1 }
 0x6de   :  { %v2000_v23 = vpop.permute.xlu1 %1999  ;;  %v1874_v60 = vpop.permute.xlu0 %1873  ;;  %3338 = vmatprep.subr.bf16.mxu1 %v3814_v38 }
 0x6df   :  { %v2009_v7 = vadd.f32 %v2000_v23, %v1979_v4  ;;  %v1882_v10 = vadd.f32 %v1874_v60, %v1852_v5  ;;  %v4559_v23 = vrot.slane %v4535_v21, %v4331_v11  ;;  %v4564_v60 = vld [vmem:[%s4762_s14] sm:$0xf] }
 0x6e1   :  { %3339 = vmatpush3.bf16.msra.mxu1 %v3815_v39 }
 0x6e2   :  { %v1902_v0 = vpop.permute.xlu1 %1901  ;;  %v2002_v2 = vpop.permute.xlu0 %2001  ;;  %3340 = vmatprep.subr.bf16.mxu1 %v3816_v40 }
 0x6e3   :  { %v1911_v6 = vadd.f32 %v1902_v0, %v1881_v63  ;;  %v2010_v24 = vadd.f32 %v2002_v2, %v1980_v15  ;;  %v4574_v63 = vrot.slane %v4535_v21, %v4336_v20 }
 0x6e5   :  { %1926 = vperm.xlu0 %3483, %v1911_v6   ;;  %v4586_v6 = vrot.slane %v4564_v60, %v4325_v9 }
 0x6e6   :  { %v2030_v12 = vpop.permute.xlu1 %2029  ;;  %v1904_v13 = vpop.permute.xlu0 %1903 }
 0x6e7   :  { %v2039_v8 = vadd.f32 %v2030_v12, %v2009_v7  ;;  %v1912_v17 = vadd.f32 %v1904_v13, %v1882_v10  ;;  %v4590_v7 = vrot.slane %v4564_v60, %v4336_v20 }
 0x6e9   :  { %1931 = vperm.xlu1 %3482, %v1912_v17   ;;  %2055 = vperm.xlu0 %3483, %v2039_v8   ;;  %v4598_v17 = vrot.slane %v4564_v60, %v4331_v11 }
 0x6ea   :  { %v2121_v29 = vpop.permute.xlu1 %2120  ;;  %v2032_v30 = vpop.permute.xlu0 %2031 }
 0x6eb   :  { %v2040_v41 = vadd.f32 %v2032_v30, %v2010_v24  ;;  %v2130_v31 = vadd.f32 %v2121_v29, %v4446_v42  ;;  %v3817_v42 = vld [vmem:[#allocation13 + $0x10] sm:$0xff]  }
 0x6ec   :  { %3341 = vmatpush3.bf16.msra.mxu1 %v3817_v42 }
 0x6ed   :  { %2060 = vperm.xlu1 %3482, %v2040_v41   ;;  %3342 = vmatprep.subr.bf16.mxu1 %v3818_v43 }
 0x6ee   :  { %v2151_v16 = vpop.permute.xlu1 %2150  ;;  %v2123_v32 = vpop.permute.xlu0 %2122 }
 0x6ef   :  { %v2160_v33 = vadd.f32 %v2151_v16, %v2130_v31  ;;  %v2131_v34 = vadd.f32 %v2123_v32, %v4459_v44  ;;  %v3820_v44 = vld [vmem:[#allocation13 + $0x60] sm:$0xff]  }
 0x6f0   :  { %3343 = vmatpush3.bf16.msra.mxu1 %v3819_v25 }
 0x6f1   :  { %2176 = vperm.xlu0 %3483, %v2160_v33   ;;  %3344 = vmatprep.subr.bf16.mxu1 %v3820_v44 }
 0x6f2   :  { %v2153_v35 = vpop.permute.xlu0 %2152 }
 0x6f3   :  { %v2161_v36 = vadd.f32 %v2153_v35, %v2131_v34 }
 0x6f4   :  { %3345 = vmatpush3.bf16.msra.mxu1 %v3821_v45 }
 0x6f5   :  { %2181 = vperm.xlu1 %3482, %v2161_v36   ;;  %3346 = vmatprep.subr.bf16.mxu1 %v3822_v46 }
 0x74c   :  { %v4512_v28 = vpop.permute.xlu1 %1916  ;;  %v4514_v18 = vpop.permute.xlu0 %1921 }
 0x74d   :  { %v1957_v48 = vmul.f32 %v4505_v27, %v4512_v28  ;;  %v1961_v50 = vmul.f32 %v4505_v27, %v4514_v18  ;;  %v1955_v0 = vmul.f32 %v4539_v37, %v4512_v28  ;;  %v1959_v2 = vmul.f32 %v4539_v37, %v4514_v18 }
 0x74e   :  { %v1960_v4 = vmul.f32 %v4547_v55, %v4514_v18  ;;  %v1956_v10 = vmul.f32 %v4547_v55, %v4512_v28 }
 0x750   :  { %v4528_v52 = vpop.permute.xlu1 %2045 }
 0x751   :  { %v2086_v53 = vmul.f32 %v4520_v49, %v4528_v52  ;;  %v2084_v57 = vmul.f32 %v4526_v51, %v4528_v52  ;;  %v2085_v3 = vmul.f32 %v4543_v54, %v4528_v52 }
 0x753   :  { %v2102_v56 = vadd.f32 %v2086_v53, %v1957_v48  ;;  %v2100_v12 = vadd.f32 %v2084_v57, %v1955_v0  ;;  %v2101_v41 = vadd.f32 %v2085_v3, %v1956_v10  ;;  %v4621_v3 = vrot.slane %v4501_v14, %v4342_v22 }
 0x754   :  { %v4551_v58 = vpop.permute.xlu1 %2050  ;;  %v4629_v10 = vrot.slane %v4535_v21, %v4342_v22 }
 0x755   :  { %v2088_v19 = vmul.f32 %v4526_v51, %v4551_v58  ;;  %v2089_v61 = vmul.f32 %v4543_v54, %v4551_v58  ;;  %v2090_v62 = vmul.f32 %v4520_v49, %v4551_v58 }
 0x757   :  { %v2106_v5 = vadd.f32 %v2090_v62, %v1961_v50  ;;  %v2104_v13 = vadd.f32 %v2088_v19, %v1959_v2  ;;  %v2105_v24 = vadd.f32 %v2089_v61, %v1960_v4  ;;  %v3769_v62 = vld [vmem:[#allocation11 + $0x114] ss:$8 sps:$4 sm:$0xff]   ;;  %v3767_v2 = vld [vmem:[#allocation11 + $0x110] ss:$8 sps:$4 sm:$0xff]   ;;  %v4625_v4 = vrot.slane %v4510_v47, %v4342_v22 }
 0x758   :  { %v2172_v15 = vpop.permute.xlu1 %2171  ;;  %v4594_v8 = vpop.permute.xlu0 %2166 }
 0x759   :  { %v2209_v29 = vmul.f32 %v4555_v59, %v2172_v15  ;;  %v2210_v30 = vmul.f32 %v4559_v23, %v2172_v15  ;;  %v2211_v20 = vmul.f32 %v4574_v63, %v2172_v15  ;;  %v2205_v31 = vmul.f32 %v4555_v59, %v4594_v8 }
 0x75a   :  { %v2206_v16 = vmul.f32 %v4559_v23, %v4594_v8  ;;  %v2207_v32 = vmul.f32 %v4574_v63, %v4594_v8  ;;  %v2087_v21 = vmul.f32 %v4625_v4, %v4528_v52 }
 0x75b   :  { %v2225_v33 = vadd.f32 %v2209_v29, %v2104_v13  ;;  %v2226_v34 = vadd.f32 %v2210_v30, %v2105_v24  ;;  %v2227_v35 = vadd.f32 %v2211_v20, %v2106_v5  ;;  %v2221_v36 = vadd.f32 %v2205_v31, %v2100_v12  ;;  %v3772_v5 = vld [vmem:[#allocation11 + $0x124] ss:$8 sps:$4 sm:$0xff]   ;;  %v3770_v29 = vld [vmem:[#allocation11 + $0x120] ss:$8 sps:$4 sm:$0xff]   ;;  %v3775_v20 = vld [vmem:[#allocation11 + $0x134] ss:$8 sps:$4 sm:$0xff]  }
 0x75c   :  { %v2222_v26 = vadd.f32 %v2206_v16, %v2101_v41  ;;  %v2223_v1 = vadd.f32 %v2207_v32, %v2102_v56  ;;  %v3764_v56 = vld [vmem:[#allocation11 + $0x100] ss:$8 sps:$4 sm:$0xff]   ;;  %v2091_v24 = vmul.f32 %v4625_v4, %v4551_v58  ;;  %v1962_v30 = vmul.f32 %v4621_v3, %v4514_v18 }
 0x75d   :  { %v2263_v38 = vadd.f32 %v4586_v6, %v2225_v33  ;;  %v2265_v39 = vadd.f32 %v4590_v7, %v2227_v35  ;;  %v2264_v40 = vadd.f32 %v4598_v17, %v2226_v34  ;;  %v2259_v42 = vadd.f32 %v4586_v6, %v2221_v36 }
 0x75e   :  { %v2261_v43 = vadd.f32 %v4590_v7, %v2223_v1  ;;  %v2260_v25 = vadd.f32 %v4598_v17, %v2222_v26  ;;  %v2212_v41 = vmul.f32 %v4629_v10, %v2172_v15  ;;  %v1958_v33 = vmul.f32 %v4621_v3, %v4512_v28  ;;  %v3773_v26 = vld [vmem:[#allocation11 + $0x130] ss:$8 sps:$4 sm:$0xff]   ;;  %v3778_v28 = vld [vmem:[#allocation11 + $0x144] ss:$8 sps:$4 sm:$0xff]  }
 0x75f   :  { %v2281_v44 = vmax.f32 %v2265_v39, 0.0  ;;  %v2280_v45 = vmax.f32 %v2264_v40, 0.0  ;;  %v2279_v46 = vmax.f32 %v2263_v38, 0.0  ;;  %v2275_v53 = vmax.f32 %v2259_v42, 0.0 }
 0x760   :  { %v2277_v48 = vmax.f32 %v2261_v43, 0.0  ;;  %v2276_v50 = vmax.f32 %v2260_v25, 0.0  ;;  %v2107_v34 = vadd.f32 %v2091_v24, %v1962_v30  ;;  %v2208_v15 = vmul.f32 %v4629_v10, %v4594_v8 }
 0x761   :  { %v2291_v19 = vpack.c.bf16 %v2279_v46, %v2275_v53  ;;  %v2103_v1 = vadd.f32 %v2087_v21, %v1958_v33  ;;  %v3781_v53 = vld [vmem:[#allocation11 + $0x154] ss:$8 sps:$4 sm:$0xff]  }
 0x762   :  { %v2292_v57 = vpack.c.bf16 %v2280_v45, %v2276_v50  ;;  %v4615_v61 = vpack.c.bf16 %v2281_v44, %v2277_v48  ;;  %v3776_v45 = vld [vmem:[#allocation11 + $0x140] ss:$8 sps:$4 sm:$0xff]  }
 0x764   :  { %2727 = vmatprep.mubr.bf16.mxu0 %v2292_v57  ;;  %v4617_v0 = vpop.permute.xlu0 %1926 }
 0x765   :  { %2728 = vmatmul.mubr.bf16.vlgmr.msra.gmra.mrb[16].mxu0 %v2291_v19  ;;  %v1965_v14 = vmul.f32 %v4505_v27, %v4617_v0  ;;  %v1963_v35 = vmul.f32 %v4539_v37, %v4617_v0  ;;  %v1964_v36 = vmul.f32 %v4547_v55, %v4617_v0 }
 0x766   :  { %2749 = vmatpush1.bf16.msra.mxu0 %v3764_v56 }
 0x767   :  { %2750 = vmatprep.subr.bf16.mxu0 %v3769_v62 }
 0x768   :  { %v4631_v12 = vpop.permute.xlu1 %1931  ;;  %v4633_v13 = vpop.permute.xlu0 %2055 }
 0x769   :  { %v2094_v47 = vmul.f32 %v4520_v49, %v4633_v13  ;;  %v2092_v58 = vmul.f32 %v4526_v51, %v4633_v13  ;;  %v2093_v31 = vmul.f32 %v4543_v54, %v4633_v13  ;;  %v1969_v18 = vmul.f32 %v4505_v27, %v4631_v12 }
 0x76a   :  { %2751 = vmatpush1.bf16.msra.mxu0 %v3767_v2  ;;  %v4666_v27 = vrot.slane %v4564_v60, %v4342_v22  ;;  %v2224_v60 = vadd.f32 %v2208_v15, %v2103_v1  ;;  %v1968_v46 = vmul.f32 %v4547_v55, %v4631_v12 }
 0x76b   :  { %2752 = vmatprep.subr.bf16.mxu0 %v3772_v5  ;;  %v2110_v32 = vadd.f32 %v2094_v47, %v1965_v14  ;;  %v2108_v39 = vadd.f32 %v2092_v58, %v1963_v35  ;;  %v2109_v40 = vadd.f32 %v2093_v31, %v1964_v36  ;;  %v3779_v5 = vld [vmem:[#allocation11 + $0x150] ss:$8 sps:$4 sm:$0xff]   ;;  %v3782_v58 = vld [vmem:[#allocation11 + $0x160] ss:$8 sps:$4 sm:$0xff]  }
 0x76c   :  { %v4650_v16 = vpop.permute.xlu1 %2060  ;;  %v2262_v47 = vadd.f32 %v4666_v27, %v2224_v60  ;;  %v3800_v60 = vld [vmem:[#allocation11 + $0x1c0] ss:$8 sps:$4 sm:$0xff]  }
 0x76d   :  { %v2098_v52 = vmul.f32 %v4520_v49, %v4650_v16  ;;  %v2228_v49 = vadd.f32 %v2212_v41, %v2107_v34  ;;  %v2096_v8 = vmul.f32 %v4526_v51, %v4650_v16  ;;  %v2097_v43 = vmul.f32 %v4543_v54, %v4650_v16  ;;  %v3787_v34 = vld [vmem:[#allocation11 + $0x174] ss:$8 sps:$4 sm:$0xff]  }
 0x76e   :  { %2753 = vmatpush1.bf16.msra.mxu0 %v3770_v29  ;;  %v1967_v51 = vmul.f32 %v4539_v37, %v4631_v12  ;;  %v2278_v33 = vmax.f32 %v2262_v47, 0.0 }
 0x76f   :  { %2754 = vmatprep.subr.bf16.mxu0 %v3775_v20  ;;  %v2114_v38 = vadd.f32 %v2098_v52, %v1969_v18  ;;  %v2266_v19 = vadd.f32 %v4666_v27, %v2228_v49  ;;  %v2113_v62 = vadd.f32 %v2097_v43, %v1968_v46  ;;  %v3793_v49 = vld [vmem:[#allocation11 + $0x194] ss:$8 sps:$4 sm:$0xff]   ;;  %v2095_v46 = vmul.f32 %v4625_v4, %v4633_v13 }
 0x770   :  { %v4670_v42 = vpop.permute.xlu0 %2176  ;;  %v2112_v57 = vadd.f32 %v2096_v8, %v1967_v51  ;;  %v3791_v8 = vld [vmem:[#allocation11 + $0x190] ss:$8 sps:$4 sm:$0xff]   ;;  %v3799_v43 = vld [vmem:[#allocation11 + $0x1b4] ss:$8 sps:$4 sm:$0xff]  }
 0x771   :  { %v2213_v25 = vmul.f32 %v4555_v59, %v4670_v42  ;;  %v2214_v44 = vmul.f32 %v4559_v23, %v4670_v42  ;;  %v2215_v22 = vmul.f32 %v4574_v63, %v4670_v42  ;;  %v2282_v18 = vmax.f32 %v2266_v19, 0.0  ;;  %v3805_v51 = vld [vmem:[#allocation11 + $0x1d4] ss:$8 sps:$4 sm:$0xff]  }
 0x772   :  { %2755 = vmatpush1.bf16.msra.mxu0 %v3773_v26 }
 0x773   :  { %v2229_v48 = vadd.f32 %v2213_v25, %v2108_v39  ;;  %v2230_v54 = vadd.f32 %v2214_v44, %v2109_v40  ;;  %v2231_v50 = vadd.f32 %v2215_v22, %v2110_v32  ;;  %2756 = vmatprep.subr.bf16.mxu0 %v3778_v28  ;;  %v3796_v39 = vld [vmem:[#allocation11 + $0x1a4] ss:$8 sps:$4 sm:$0xff]   ;;  %v3794_v40 = vld [vmem:[#allocation11 + $0x1a0] ss:$8 sps:$4 sm:$0xff]   ;;  %v3797_v25 = vld [vmem:[#allocation11 + $0x1b0] ss:$8 sps:$4 sm:$0xff]   ;;  %v2099_v22 = vmul.f32 %v4625_v4, %v4650_v16 }
 0x774   :  { %v4684_v56 = vpop.permute.xlu1 %2181  ;;  %v3802_v44 = vld [vmem:[#allocation11 + $0x1c4] ss:$8 sps:$4 sm:$0xff]   ;;  %v3811_v4 = vld [vmem:[#allocation11 + $0x1f4] ss:$8 sps:$4 sm:$0xff]  }
 0x775   :  { %v2217_v2 = vmul.f32 %v4555_v59, %v4684_v56  ;;  %v2218_v37 = vmul.f32 %v4559_v23, %v4684_v56  ;;  %v2219_v55 = vmul.f32 %v4574_v63, %v4684_v56  ;;  %v2268_v24 = vadd.f32 %v4598_v17, %v2230_v54  ;;  %v3784_v59 = vld [vmem:[#allocation11 + $0x164] ss:$8 sps:$4 sm:$0xff]  }
 0x776   :  { %2757 = vmatpush1.bf16.msra.mxu0 %v3776_v45  ;;  %v2267_v14 = vadd.f32 %v4586_v6, %v2229_v48  ;;  %v2269_v29 = vadd.f32 %v4590_v7, %v2231_v50  ;;  %v1970_v45 = vmul.f32 %v4621_v3, %v4631_v12  ;;  %v2220_v48 = vmul.f32 %v4629_v10, %v4684_v56  ;;  %v3809_v56 = vld [vmem:[#allocation11 + $0x1f0] ss:$8 sps:$4 sm:$0xff]  }
 0x777   :  { %v2233_v30 = vadd.f32 %v2217_v2, %v2112_v57  ;;  %v2234_v21 = vadd.f32 %v2218_v37, %v2113_v62  ;;  %v2235_v20 = vadd.f32 %v2219_v55, %v2114_v38  ;;  %2758 = vmatprep.subr.bf16.mxu0 %v3781_v53  ;;  %v2284_v31 = vmax.f32 %v2268_v24, 0.0  ;;  %v3788_v38 = vld [vmem:[#allocation11 + $0x180] ss:$8 sps:$4 sm:$0xff]   ;;  %v3803_v53 = vld [vmem:[#allocation11 + $0x1d0] ss:$8 sps:$4 sm:$0xff]  }
 0x778   :  { %v2283_v32 = vmax.f32 %v2267_v14, 0.0  ;;  %v2285_v35 = vmax.f32 %v2269_v29, 0.0  ;;  %v1966_v54 = vmul.f32 %v4621_v3, %v4617_v0  ;;  %v2216_v50 = vmul.f32 %v4629_v10, %v4670_v42  ;;  %v3808_v57 = vld [vmem:[#allocation11 + $0x1e4] ss:$8 sps:$4 sm:$0xff]   ;;  %v3806_v2 = vld [vmem:[#allocation11 + $0x1e0] ss:$8 sps:$4 sm:$0xff]  }
 0x779   :  { %v2272_v23 = vadd.f32 %v4598_v17, %v2234_v21  ;;  %v2271_v41 = vadd.f32 %v4586_v6, %v2233_v30  ;;  %v2273_v63 = vadd.f32 %v4590_v7, %v2235_v20  ;;  %v3785_v17 = vld [vmem:[#allocation11 + $0x170] ss:$8 sps:$4 sm:$0xff]   ;;  %v2294_v6 = vpack.c.bf16 %v2282_v18, %v2278_v33  ;;  %v3790_v7 = vld [vmem:[#allocation11 + $0x184] ss:$8 sps:$4 sm:$0xff]  }
 0x77a   :  { %2759 = vmatpush1.bf16.msra.mxu0 %v3779_v5  ;;  %v2115_v16 = vadd.f32 %v2099_v22, %v1970_v45  ;;  %v2111_v19 = vadd.f32 %v2095_v46, %v1966_v54  ;;  %v3823_v37 = vld [vmem:[#allocation13 + $0x28] sm:$0xff]   ;;  %v3824_v55 = vld [vmem:[#allocation13 + $0x70] sm:$0xff]   ;;  %v3826_v24 = vld [vmem:[#allocation13 + $0x78] sm:$0xff]  }
 0x77b   :  { %2760 = vmatprep.subr.bf16.mxu0 %v3784_v59  ;;  %v2288_v52 = vmax.f32 %v2272_v23, 0.0  ;;  %v2287_v15 = vmax.f32 %v2271_v41, 0.0  ;;  %v2289_v36 = vmax.f32 %v2273_v63, 0.0  ;;  %3347 = vmatpush3.bf16.msra.mxu1 %v3823_v37  ;;  %v3825_v5 = vld [vmem:[#allocation13 + $0x30] sm:$0xff]   ;;  %v3827_v14 = vld [vmem:[#allocation13 + $0x38] sm:$0xff]  }
 0x77c   :  { %v2236_v62 = vadd.f32 %v2220_v48, %v2115_v16  ;;  %v2232_v12 = vadd.f32 %v2216_v50, %v2111_v19  ;;  %3348 = vmatprep.subr.bf16.mxu1 %v3824_v55 }
 0x77d   :  { %v2296_v26 = vpack.c.bf16 %v2288_v52, %v2284_v31  ;;  %v2295_v1 = vpack.c.bf16 %v2287_v15, %v2283_v32  ;;  %v2297_v28 = vpack.c.bf16 %v2289_v36, %v2285_v35 }
 0x77e   :  { %2761 = vmatpush1.bf16.msra.mxu0 %v3782_v58  ;;  %v2274_v13 = vadd.f32 %v4666_v27, %v2236_v62  ;;  %v2270_v0 = vadd.f32 %v4666_v27, %v2232_v12  ;;  %v2363_v27 = vld [vmem:[%s4764_s16] sm:$0x3]  ;;  %s4068_s16 = smov [#allocation15]  }
 0x77f   :  { %2737 = vmatprep.mubr.bf16.mxu0 %v2296_v26  ;;  %2762 = vmatprep.subr.bf16.mxu0 %v3787_v34  ;;  %v2368_v47 = vrot.slane %v2363_v27, %v4325_v9  ;;  %s3032_s27 = sshll.u32 %s4068_s16, 4  ;;  %s3033_s27 = int_to_ptr.vmem [resolvable:$true] %s3032_s27 }
 0x780   :  { %2738 = vmatmul.mubr.bf16.gmra.mrb[20].mxu0 %v2295_v1  ;;  %v2290_v3 = vmax.f32 %v2274_v13, 0.0  ;;  %v2286_v10 = vmax.f32 %v2270_v0, 0.0  ;;  %3349 = vmatpush3.bf16.msra.mxu1 %v3825_v5  ;;  %s3986_s7 = scalar_lea.vmem %s3033_s27, 32  ;;  %p3991_p1 = scmp.lt.s32.totalorder %s3033_s27, %s3033_s27 }
 0x781   :  { %2780 = vmatprep.mubr.bf16.mxu0 %v2294_v6  ;;  %3350 = vmatprep.subr.bf16.mxu1 %v3826_v24  ;;  %p3987_p0 = scmp.ne.s32.totalorder %s3033_s27, %s3986_s7  ;;  %p3992_p2 = scmp.lt.s32.totalorder %s3986_s7, %s3986_s7 }
 0x782   :  { %2763 = vmatpush1.bf16.msra.mxu0 %v3785_v17  ;;  %v2298_v42 = vpack.c.bf16 %v2290_v3, %v2286_v10 }
 0x783   :  { %2764 = vmatprep.subr.bf16.mxu0 %v3790_v7  ;;  %p3993_p3 = por %p3992_p2, %p3991_p1 }
 0x784   :  { %3351 = vmatpush3.bf16.msra.mxu1 %v3827_v14 }
 0x785   :  { %p3994_p4 = pnand %p3993_p3, %p3987_p0 }
 0x786   :  { %2765 = vmatpush1.bf16.msra.mxu0 %v3788_v38 }
 0x787   :  { %2766 = vmatprep.subr.bf16.mxu0 %v3793_v49 }
 0x78a   :  { %2767 = vmatpush1.bf16.msra.mxu0 %v3791_v8 }
 0x78b   :  { %2768 = vmatprep.subr.bf16.mxu0 %v3796_v39 }
 0x78e   :  { %2769 = vmatpush1.bf16.msra.mxu0 %v3794_v40 }
 0x78f   :  { %2770 = vmatprep.subr.bf16.mxu0 %v3799_v43 }
 0x792   :  { %2771 = vmatpush1.bf16.msra.mxu0 %v3797_v25 }
 0x793   :  { %2772 = vmatprep.subr.bf16.mxu0 %v3802_v44 }
 0x796   :  { %2773 = vmatpush1.bf16.msra.mxu0 %v3800_v60 }
 0x797   :  { %2774 = vmatprep.subr.bf16.mxu0 %v3805_v51 }
 0x79a   :  { %2775 = vmatpush1.bf16.msra.mxu0 %v3803_v53 }
 0x79b   :  { %2776 = vmatprep.subr.bf16.mxu0 %v3808_v57 }
 0x79e   :  { %2777 = vmatpush1.bf16.msra.mxu0 %v3806_v2 }
 0x79f   :  { %2778 = vmatprep.subr.bf16.mxu0 %v3811_v4 }
 0x7a2   :  { %2779 = vmatpush1.bf16.msra.mxu0 %v3809_v56 }
 0x7a5   :  { %2781 = vmatmul.mubr.bf16.vlgmr.msra.gmra.mrb[16].mxu0 %v4615_v61  ;;  %v2372_v61 = vrot.slane %v2363_v27, %v4331_v11 }
 0x7a6   :  { %2790 = vmatprep.mubr.bf16.mxu0 %v2298_v42 }
 0x7ad   :  { %2791 = vmatmul.mubr.bf16.gmra.mrb[20].mxu0 %v2297_v28 }
 0x878   :  { %v2782_v29 = vpop.f32.mrb[16].mxu0 }
 0x879   :  { %v3425_v30 = vadd.f32 %v2782_v29, %v2368_v47  ;;  %v2784_v21 = vpop.f32.mrb[17].mxu0 }
 0x87a   :  { %v3426_v20 = vadd.f32 %v2784_v21, %v2372_v61  ;;  %v2786_v59 = vpop.f32.mrb[18].mxu0 }
 0x87b   :  { %v3427_v23 = vadd.f32 %v2786_v59, %v2368_v47  ;;  %v2788_v41 = vpop.f32.mrb[19].mxu0  ;;  %v2801_v58 = vmax.f32 %v3425_v30, 0.0 }
 0x87c   :  { %v3428_v63 = vadd.f32 %v2788_v41, %v2372_v61  ;;  %v2802_v32 = vmax.f32 %v3426_v20, 0.0 }
 0x87d   :  { %v2803_v31 = vmax.f32 %v3427_v23, 0.0 }
 0x87e   :  { %v2804_v33 = vmax.f32 %v3428_v63, 0.0 }
 0x87f   :  { %v2809_v18 = vpack.c.bf16 %v2803_v31, %v2801_v58 }
 0x880   :  { %v2810_v52 = vpack.c.bf16 %v2804_v33, %v2802_v32  ;;  %v2792_v34 = vpop.f32.mrb[20].mxu0 }
 0x881   :  { %v3429_v15 = vadd.f32 %v2792_v34, %v2368_v47  ;;  %v2794_v35 = vpop.f32.mrb[21].mxu0 }
 0x882   :  { %v3430_v9 = vadd.f32 %v2794_v35, %v2372_v61  ;;  %v2796_v36 = vpop.f32.mrb[22].mxu0  ;;  %2980 = vmatprep.mubr.bf16.mxu1 %v2810_v52 }
 0x883   :  { %v3431_v11 = vadd.f32 %v2796_v36, %v2368_v47  ;;  %v2798_v26 = vpop.f32.mrb[23].mxu0  ;;  %2981 = vmatmul.mubr.bf16.vlgmr.msra.gmra.mrb[20].mxu1 %v2809_v18  ;;  %v2805_v28 = vmax.f32 %v3429_v15, 0.0 }
 0x884   :  { %v3432_v1 = vadd.f32 %v2798_v26, %v2372_v61  ;;  %v2806_v6 = vmax.f32 %v3430_v9, 0.0 }
 0x885   :  { %v2807_v17 = vmax.f32 %v3431_v11, 0.0 }
 0x886   :  { %v2808_v7 = vmax.f32 %v3432_v1, 0.0 }
 0x887   :  { %v2811_v38 = vpack.c.bf16 %v2807_v17, %v2805_v28 }
 0x888   :  { %v2812_v49 = vpack.c.bf16 %v2808_v7, %v2806_v6 }
 0x88a   :  { %2988 = vmatprep.mubr.bf16.mxu1 %v2812_v49 }
 0x88b   :  { %2989 = vmatmul.mubr.bf16.gmra.mrb[24].mxu1 %v2811_v38 }
 0x88c   :  { %3997 = shalt.err (!%p3994_p4)
}
 0x88d   :  { %s3998_s28 = scalar_lea.hbm %s4768_s20, 32 }
 0x88e   :  { %p3999_p5 = scmp.ne.s32.totalorder %s4768_s20, %s3998_s28  ;;  %p4002_p6 = scmp.lt.u32.totalorder %s3998_s28, %s4768_s20 }
 0x890   :  { %p4004_p7 = pnand %p4002_p6, %p3999_p5 }
 0x892   :  { %4007 = shalt.err (!%p4004_p7)
}
 0x893   :  { %3035 = dma.vmem_to_hbm [thread:$0]  %s3033_s27, 32, %s4768_s20, [#allocation16]   ;;  %v3280_v25 = vld [vmem:[%s4766_s18] ss:$0 sm:$0xff] }
 0x894   :  { %s4069_s18 = smov [#allocation14]  }
 0x895   :  { %s3022_s20 = sshll.u32 %s4069_s18, 4  ;;  %s3023_s20 = int_to_ptr.vmem [resolvable:$true] %s3022_s20 }
 0x896   :  { %s4008_s21 = scalar_lea.vmem %s3023_s20, 32  ;;  %p4013_p9 = scmp.lt.s32.totalorder %s3023_s20, %s3023_s20 }
 0x897   :  { %p4009_p8 = scmp.ne.s32.totalorder %s3023_s20, %s4008_s21  ;;  %p4014_p10 = scmp.lt.s32.totalorder %s4008_s21, %s4008_s21 }
 0x899   :  { %p4015_p11 = por %p4014_p10, %p4013_p9 }
 0x89b   :  { %p4016_p12 = pnand %p4015_p11, %p4009_p8 }
 0x956   :  { %v3352_v8 = vpop.f32.mrb[20].mxu1 }
 0x957   :  { %v3353_v39 = vpop.f32.mrb[21].mxu1 }
 0x958   :  { %v3354_v40 = vadd.f32 %v3353_v39, %v3352_v8  ;;  %v3355_v43 = vpop.f32.mrb[22].mxu1 }
 0x959   :  { %v3356_v44 = vpop.f32.mrb[23].mxu1 }
 0x95a   :  { %v3357_v22 = vadd.f32 %v3356_v44, %v3355_v43  ;;  %v2983_v60 = vadd.f32 %v3354_v40, %v3280_v25 }
 0x95c   :  { %v2986_v51 = vadd.f32 %v3357_v22, %v3280_v25 }
 0x95e   :  { %v2997_v45 = vmax.f32 %v2983_v60, %v2986_v51  ;;  %v3358_v46 = vpop.f32.mrb[24].mxu1 }
 0x95f   :  { %v3359_v48 = vpop.f32.mrb[25].mxu1 }
 0x960   :  { %v2998_v54 = vrot.slane %v2997_v45, 4  ;;  %v3360_v50 = vadd.f32 %v3359_v48, %v3358_v46  ;;  %v3361_v16 = vpop.f32.mrb[26].mxu1 }
 0x961   :  { %v3362_v53 = vpop.f32.mrb[27].mxu1 }
 0x962   :  { %v2999_v57 = vmax.f32 %v2997_v45, %v2998_v54  ;;  %v3363_v19 = vadd.f32 %v3362_v53, %v3361_v16  ;;  %v2991_v62 = vadd.f32 %v3360_v50, %v3280_v25 }
 0x964   :  { %v2994_v12 = vadd.f32 %v3363_v19, %v3280_v25  ;;  %v3000_v2 = vrot.slane %v2999_v57, 2 }
 0x966   :  { %v3004_v4 = vmax.f32 %v2991_v62, %v2994_v12  ;;  %v3001_v56 = vmax.f32 %v2999_v57, %v3000_v2 }
 0x968   :  { %v3005_v13 = vrot.slane %v3004_v4, 4  ;;  %v3002_v42 = vrot.slane %v3001_v56, 1 }
 0x96a   :  { %v3006_v0 = vmax.f32 %v3004_v4, %v3005_v13  ;;  %v3003_v55 = vmax.f32 %v3001_v56, %v3002_v42 }
 0x96c   :  { %v3007_v3 = vrot.slane %v3006_v0, 2 }
 0x96e   :  { %v3008_v10 = vmax.f32 %v3006_v0, %v3007_v3 }
 0x970   :  { %v3009_v37 = vrot.slane %v3008_v10, 1 }
 0x972   :  { %v3010_v5 = vmax.f32 %v3008_v10, %v3009_v37 }
 0x974   :  { %v3013_v24 = vsel %vm1127_vm0, %v3010_v5, %v3003_v55 }
 0x975   :  { %3015 = vst [vmem:[#allocation14] sm:$0x3] %v3013_v24 }
 0x976   :  { %4019 = shalt.err (!%p4016_p12)
}
 0x977   :  { %s4020_s1 = scalar_lea.hbm %s4767_s19, 32 }
 0x978   :  { %p4021_p13 = scmp.ne.s32.totalorder %s4767_s19, %s4020_s1  ;;  %p4024_p0 = scmp.lt.u32.totalorder %s4020_s1, %s4767_s19 }
 0x97a   :  { %p4026_p1 = pnand %p4024_p0, %p4021_p13 }
 0x97c   :  { %4029 = shalt.err (!%p4026_p1)
}
 0x97d   :  { %3025 = dma.vmem_to_hbm [thread:$0]  %s3023_s20, 32, %s4767_s19, [#allocation4]  }
 0x97e   :  { %4038 = dma.done.wait [#allocation4], 32  }
 0x97f   :  { %4039 = vsyncadd [#allocation4], 4294967264 }
 0x980   :  { %4040 = dma.done.wait [#allocation16], 32  }
 0x981   :  { %4041 = vsyncadd [#allocation16], 4294967264 }
 0x982   :  { %3042 = vsyncpa [#allocation3], 1 }
 0x983   :  { %3043 = vsyncpa [#allocation6], 1 }
 0x984   :  { %3044 = vsyncpa [#allocation9], 1 }
 0x985   :  { %3045 = vsyncpa [#allocation12], 1 }
 0x986   :  { %3046 = vsyncpa [#allocation4], 1 }
 0x987   :  { %3047 = vsyncpa [#allocation16], 1 }

</bundles_post_ra>
